<compile_context>
chip_gen: v6e
topology: v6e:2x2x1
jax: 0.10.0
libtpu: 0.0.40
codegen_flags: <defaults>
</compile_context>

<pallas_src>
import functools
import math

import jax
import jax.numpy as jnp
from jax.experimental import pallas as pl
from jax.experimental.pallas import tpu as pltpu


# ---------------------------------------------------------------------------
# helpers (trace-time only)
# ---------------------------------------------------------------------------
def _rotate_half(x):
    """Mirror of torch rotate_half, including the degenerate last-dim==1 case."""
    d = x.shape[-1]
    half = d // 2
    if half == 0:
        # torch: x1 = x[..., :0] (empty), x2 = x == x -> cat((-x2, x1)) == -x
        return -x
    return jnp.concatenate([-x[..., half:], x[..., :half]], axis=-1)


def rotary_cos_sin(seq_len, dim, theta):
    inv_freq = 1.0 / (theta ** (jnp.arange(0, dim, 2, dtype=jnp.float32) / dim))
    t = jnp.arange(seq_len, dtype=jnp.float32)
    freqs = jnp.einsum("i,j->ij", t, inv_freq)
    emb = jnp.concatenate([freqs, freqs], axis=-1)        # (S, dim)
    return jnp.cos(emb), jnp.sin(emb)


# ---------------------------------------------------------------------------
# Pallas kernel: one batch element per grid step, fully fused in VMEM.
# ---------------------------------------------------------------------------
def mla_kernel(x_ref, cos_ref, sin_ref, w1_ref, w2_ref, wo_ref, o_ref,
               *, num_heads, latent_dim):
    f32 = jnp.float32
    x = x_ref[0]                                # (S, H)
    cos = cos_ref[...]                          # (S, D)   D == head_dim
    sin = sin_ref[...]

    S, H = x.shape
    D = cos.shape[-1]
    nh = num_heads
    L = latent_dim
    Hh = H // 2

    # ---- fused projections: 2 MXU passes instead of 7 narrow matmuls -------
    y1 = jnp.dot(x, w1_ref[...], preferred_element_type=f32)      # (S, 2L + H/2)
    latent = y1[:, :2 * L]                                        # [kv_d | q_d]
    k_rope = y1[:, 2 * L:]                                        # (S, H/2)

    y2 = jnp.dot(latent, w2_ref[...], preferred_element_type=f32)  # (S, H/2 + 2H)
    k_proj = y2[:, :Hh]                                            # (S, H/2)
    v      = y2[:, Hh:Hh + H]                                      # (S, H)
    q_proj = y2[:, Hh + H:Hh + H + Hh]                             # (S, H/2) pre-scaled
    q_rope = y2[:, Hh + H + Hh:]                                   # (S, H/2) pre-scaled

    # ---- head split: (S, nh*c) -> (nh, S, c), one relayout per tensor ------
    def heads(t):
        c = t.shape[-1] // nh
        return jnp.swapaxes(t.reshape(S, nh, c), 0, 1)

    qp, kp = heads(q_proj), heads(k_proj)       # (nh, S, p)
    qr, kr = heads(q_rope), heads(k_rope)       # (nh, S, r)
    vh = heads(v)                               # (nh, S, D)

    # ---- rope with torch broadcast semantics (per-head width r -> D) -------
    cos3, sin3 = cos[None, :, :], sin[None, :, :]                  # (1, S, D)
    qr = qr * cos3 + _rotate_half(qr) * sin3                       # (nh, S, D)
    kr = kr * cos3 + _rotate_half(kr) * sin3                       # (nh, S, D)

    # ---- head-batched attention (scale already folded into q weights) ------
    s = (jnp.einsum('hqc,hkc->hqk', qp, kp, preferred_element_type=f32) +
         jnp.einsum('hqc,hkc->hqk', qr, kr, preferred_element_type=f32))  # (nh,S,S)
    s = s - jnp.max(s, axis=-1, keepdims=True)
    e = jnp.exp(s)
    probs = e * pl.reciprocal(jnp.sum(e, axis=-1, keepdims=True), approx=True)
    o_h = jnp.einsum('hqk,hkd->hqd', probs, vh, preferred_element_type=f32)  # (nh,S,D)

    attn = jnp.swapaxes(o_h, 0, 1).reshape(S, H)                    # (S, H)
    o_ref[0] = jnp.dot(attn, wo_ref[...], preferred_element_type=f32)


def mla_forward(x, cos, sin, params, num_heads):
    B, S, H = x.shape
    D = cos.shape[-1]
    L = params["wkvd"].shape[1]
    nh = num_heads
    Hh = H // 2
    assert H % nh == 0 and Hh % nh == 0, "hidden_size must split evenly over heads"
    p = Hh // nh                       # per-head k/q projection width
    r = Hh // nh                       # per-head rope width (pre-broadcast)
    # The torch reference only runs when the (..., r) x (..., D) broadcast is
    # legal, i.e. r == D or r == 1 (in practice: head_dim == 2).
    assert r == 1 or r == D, (
        "rope broadcast in the reference module requires per-head rope width "
        "== 1 or == head_dim")
    scale = 1.0 / math.sqrt(p + D)     # SDPA default: 1/sqrt(q.shape[-1])

    # ---- wrapper-side weight fusion (trace time, outside the kernel) -------
    f32 = jnp.float32
    w1 = jnp.concatenate([params["wkvd"], params["wqd"], params["wrk"]],
                         axis=1)                                   # (H, 2L + H/2)
    top = jnp.concatenate([params["wku"], params["wvu"],
                           jnp.zeros((L, H), f32)], axis=1)        # (L, H/2 + 2H)
    bot = jnp.concatenate([jnp.zeros((L, Hh + H), f32),
                           scale * params["wqu"],
                           scale * params["wrq"]], axis=1)         # (L, H/2 + 2H)
    w2 = jnp.concatenate([top, bot], axis=0)                       # (2L, H/2 + 2H)
    wo = params["wo"]                                              # (H, H)

    def full(a):
        return pl.BlockSpec(a.shape, lambda b, _nd=a.ndim: (0,) * _nd)

    return pl.pallas_call(
        functools.partial(mla_kernel, num_heads=nh, latent_dim=L),
        out_shape=jax.ShapeDtypeStruct((B, S, H), jnp.float32),
        grid=(B,),
        in_specs=[pl.BlockSpec((1, S, H), lambda b: (b, 0, 0)),
                  full(cos), full(sin), full(w1), full(w2), full(wo)],
        out_specs=pl.BlockSpec((1, S, H), lambda b: (b, 0, 0)),
        compiler_params=pltpu.CompilerParams(
            dimension_semantics=("parallel",)),
    )(x, cos, sin, w1, w2, wo)


# ---------------------------------------------------------------------------
# pure-JAX reference (mirrors the torch code line by line, unfused weights)
# ---------------------------------------------------------------------------
def mla_reference(x, cos, sin, params, num_heads):
    B, S, H = x.shape
    kv_d = x @ params["wkvd"]
    q_d = x @ params["wqd"]
    k_proj = kv_d @ params["wku"]
    v = kv_d @ params["wvu"]
    q_proj = q_d @ params["wqu"]
    k_rope = x @ params["wrk"]
    q_rope = q_d @ params["wrq"]

    to_heads = lambda t: t.reshape(B, S, num_heads, -1)
    k_proj, q_proj = to_heads(k_proj), to_heads(q_proj)
    k_rope, q_rope, v = to_heads(k_rope), to_heads(q_rope), to_heads(v)

    cos4, sin4 = cos[None, None], sin[None, None]

    def rope(t):                                 # (B, S, nh, r)
        tt = jnp.transpose(t, (0, 2, 1, 3))      # (B, nh, S, r)
        emb = tt * cos4 + _rotate_half(tt) * sin4
        return jnp.transpose(emb, (0, 2, 1, 3))

    k_rope, q_rope = rope(k_rope), rope(q_rope)
    k = jnp.transpose(jnp.concatenate([k_proj, k_rope], -1), (0, 2, 1, 3))
    q = jnp.transpose(jnp.concatenate([q_proj, q_rope], -1), (0, 2, 1, 3))
    vt = jnp.transpose(v, (0, 2, 1, 3))

    scale = 1.0 / math.sqrt(q.shape[-1])
    s = jnp.einsum("bhqd,bhkd->bhqk", q, k) * scale
    probs = jax.nn.softmax(s, axis=-1)
    o = jnp.einsum("bhqk,bhkd->bhqd", probs, vt)
    o = jnp.transpose(o, (0, 2, 1, 3)).reshape(B, S, H)
    return o @ params["wo"]


# ---------------------------------------------------------------------------
if __name__ == "__main__":
    # config chosen so the reference PyTorch module actually runs: head_dim == 2
    batch, seq_len = 2, 8
    hidden_size, num_heads = 32, 16
    head_dim = hidden_size // num_heads          # = 2
    compression_ratio = 4
    latent_dim = hidden_size // compression_ratio
    rope_theta = 10000.0

    key = jax.random.PRNGKey(0)
    keys = jax.random.split(key, 9)

    def w(k, shape):                             # (in, out), std=0.02 like torch init
        return (0.02 * jax.random.normal(k, shape)).astype(jnp.float32)

    params = {
        "wkvd": w(keys[0], (hidden_size, latent_dim)),
        "wqd":  w(keys[1], (hidden_size, latent_dim)),
        "wku":  w(keys[2], (latent_dim, hidden_size // 2)),
        "wvu":  w(keys[3], (latent_dim, hidden_size)),
        "wqu":  w(keys[4], (latent_dim, hidden_size // 2)),
        "wrk":  w(keys[5], (hidden_size, hidden_size // 2)),
        "wrq":  w(keys[6], (latent_dim, hidden_size // 2)),
        "wo":   w(keys[7], (hidden_size, hidden_size)),
    }

    x = jax.random.normal(keys[8], (batch, seq_len, hidden_size), dtype=jnp.float32)
    cos, sin = rotary_cos_sin(seq_len, head_dim, rope_theta)

    out = mla_forward(x, cos, sin, params, num_heads)
    out = jax.block_until_ready(out)

    ref = mla_reference(x, cos, sin, params, num_heads)
    assert out.shape == (batch, seq_len, hidden_size)
    assert jnp.allclose(out, ref, rtol=1e-3, atol=1e-5), (
        f"mismatch: max abs err {jnp.max(jnp.abs(out - ref))}")

    print("KERNEL_OK")
</pallas_src>

<mosaic_0001>
module attributes {stable_mosaic.version = 11 : i64} {
  func.func @mla_kernel(%arg0: i32, %arg1: memref<1x8x32xf32, #tpu.memory_space<vmem>>, %arg2: memref<8x2xf32, #tpu.memory_space<vmem>>, %arg3: memref<8x2xf32, #tpu.memory_space<vmem>>, %arg4: memref<32x32xf32, #tpu.memory_space<vmem>>, %arg5: memref<16x80xf32, #tpu.memory_space<vmem>>, %arg6: memref<32x32xf32, #tpu.memory_space<vmem>>, %arg7: memref<1x8x32xf32, #tpu.memory_space<vmem>>) attributes {dimension_semantics = [#tpu.dimension_semantics<parallel>], iteration_bounds = array<i64: 2>, scalar_prefetch = 0 : i64, scratch_operands = 0 : i64, tpu.core_type = #tpu.core_type<tc>, window_params = [{transform_indices = @transform_0, window_bounds = array<i64: 1, 8, 32>}, {pipeline_mode = #tpu.pipeline_mode<synchronous>, transform_indices = @transform_1, window_bounds = array<i64: 8, 2>}, {pipeline_mode = #tpu.pipeline_mode<synchronous>, transform_indices = @transform_2, window_bounds = array<i64: 8, 2>}, {pipeline_mode = #tpu.pipeline_mode<synchronous>, transform_indices = @transform_3, window_bounds = array<i64: 32, 32>}, {pipeline_mode = #tpu.pipeline_mode<synchronous>, transform_indices = @transform_4, window_bounds = array<i64: 16, 80>}, {pipeline_mode = #tpu.pipeline_mode<synchronous>, transform_indices = @transform_5, window_bounds = array<i64: 32, 32>}, {transform_indices = @transform_6, window_bounds = array<i64: 1, 8, 32>}]} {
    %c0 = arith.constant 0 : index
    %c0_0 = arith.constant 0 : index
    %c0_1 = arith.constant 0 : index
    %0 = vector.load %arg1[%c0, %c0_0, %c0_1] : memref<1x8x32xf32, #tpu.memory_space<vmem>>, vector<1x8x32xf32>
    %1 = vector.shape_cast %0 : vector<1x8x32xf32> to vector<8x32xf32>
    %c0_2 = arith.constant 0 : index
    %c0_3 = arith.constant 0 : index
    %2 = vector.load %arg2[%c0_2, %c0_3] : memref<8x2xf32, #tpu.memory_space<vmem>>, vector<8x2xf32>
    %c0_4 = arith.constant 0 : index
    %c0_5 = arith.constant 0 : index
    %3 = vector.load %arg3[%c0_4, %c0_5] : memref<8x2xf32, #tpu.memory_space<vmem>>, vector<8x2xf32>
    %c0_6 = arith.constant 0 : index
    %c0_7 = arith.constant 0 : index
    %4 = vector.load %arg4[%c0_6, %c0_7] : memref<32x32xf32, #tpu.memory_space<vmem>>, vector<32x32xf32>
    %cst = arith.constant dense<0.000000e+00> : vector<8x32xf32>
    %5 = tpu.matmul %1, %4, %cst {dimension_numbers = #tpu.dot_dimension_numbers<[1], [0], [0], [1], [0, 0, 1, 1], [], []>} : vector<8x32xf32>, vector<32x32xf32>, vector<8x32xf32> -> vector<8x32xf32>
    %6 = vector.extract_strided_slice %5 {offsets = [0, 0], sizes = [8, 16], strides = [1, 1]} : vector<8x32xf32> to vector<8x16xf32>
    %7 = vector.extract_strided_slice %5 {offsets = [0, 16], sizes = [8, 16], strides = [1, 1]} : vector<8x32xf32> to vector<8x16xf32>
    %c0_8 = arith.constant 0 : index
    %c0_9 = arith.constant 0 : index
    %8 = vector.load %arg5[%c0_8, %c0_9] : memref<16x80xf32, #tpu.memory_space<vmem>>, vector<16x80xf32>
    %cst_10 = arith.constant dense<0.000000e+00> : vector<8x80xf32>
    %9 = tpu.matmul %6, %8, %cst_10 {dimension_numbers = #tpu.dot_dimension_numbers<[1], [0], [0], [1], [0, 0, 1, 1], [], []>} : vector<8x16xf32>, vector<16x80xf32>, vector<8x80xf32> -> vector<8x80xf32>
    %10 = vector.extract_strided_slice %9 {offsets = [0, 0], sizes = [8, 16], strides = [1, 1]} : vector<8x80xf32> to vector<8x16xf32>
    %11 = vector.extract_strided_slice %9 {offsets = [0, 16], sizes = [8, 32], strides = [1, 1]} : vector<8x80xf32> to vector<8x32xf32>
    %12 = vector.extract_strided_slice %9 {offsets = [0, 48], sizes = [8, 16], strides = [1, 1]} : vector<8x80xf32> to vector<8x16xf32>
    %13 = vector.extract_strided_slice %9 {offsets = [0, 64], sizes = [8, 16], strides = [1, 1]} : vector<8x80xf32> to vector<8x16xf32>
    %14 = vector.shape_cast %12 : vector<8x16xf32> to vector<8x16x1xf32>
    %15 = tpu.transpose %14, [1, 0, 2] : vector<8x16x1xf32> -> vector<16x8x1xf32>
    %16 = vector.shape_cast %10 : vector<8x16xf32> to vector<8x16x1xf32>
    %17 = tpu.transpose %16, [1, 0, 2] : vector<8x16x1xf32> -> vector<16x8x1xf32>
    %18 = vector.shape_cast %13 : vector<8x16xf32> to vector<8x16x1xf32>
    %19 = tpu.transpose %18, [1, 0, 2] : vector<8x16x1xf32> -> vector<16x8x1xf32>
    %20 = vector.shape_cast %7 : vector<8x16xf32> to vector<8x16x1xf32>
    %21 = tpu.transpose %20, [1, 0, 2] : vector<8x16x1xf32> -> vector<16x8x1xf32>
    %22 = vector.shape_cast %11 : vector<8x32xf32> to vector<8x16x2xf32>
    %23 = tpu.transpose %22, [1, 0, 2] : vector<8x16x2xf32> -> vector<16x8x2xf32>
    %24 = vector.shape_cast %2 : vector<8x2xf32> to vector<1x8x2xf32>
    %25 = vector.shape_cast %3 : vector<8x2xf32> to vector<1x8x2xf32>
    %26 = vector.broadcast %19 : vector<16x8x1xf32> to vector<16x8x2xf32>
    %27 = vector.broadcast %24 : vector<1x8x2xf32> to vector<16x8x2xf32>
    %28 = arith.mulf %26, %27 : vector<16x8x2xf32>
    %cst_11 = arith.constant 0.000000e+00 : f32
    %29 = vector.broadcast %cst_11 : f32 to vector<16x8x1xf32>
    %30 = arith.subf %29, %19 : vector<16x8x1xf32>
    %31 = vector.broadcast %30 : vector<16x8x1xf32> to vector<16x8x2xf32>
    %32 = vector.broadcast %25 : vector<1x8x2xf32> to vector<16x8x2xf32>
    %33 = arith.mulf %31, %32 : vector<16x8x2xf32>
    %34 = arith.addf %28, %33 : vector<16x8x2xf32>
    %35 = vector.broadcast %21 : vector<16x8x1xf32> to vector<16x8x2xf32>
    %36 = vector.broadcast %24 : vector<1x8x2xf32> to vector<16x8x2xf32>
    %37 = arith.mulf %35, %36 : vector<16x8x2xf32>
    %cst_12 = arith.constant 0.000000e+00 : f32
    %38 = vector.broadcast %cst_12 : f32 to vector<16x8x1xf32>
    %39 = arith.subf %38, %21 : vector<16x8x1xf32>
    %40 = vector.broadcast %39 : vector<16x8x1xf32> to vector<16x8x2xf32>
    %41 = vector.broadcast %25 : vector<1x8x2xf32> to vector<16x8x2xf32>
    %42 = arith.mulf %40, %41 : vector<16x8x2xf32>
    %43 = arith.addf %37, %42 : vector<16x8x2xf32>
    "tpu.trace_start"() <{level = 10 : i32, message = "hqc,hkc->hqk"}> : () -> ()
    %cst_13 = arith.constant dense<0.000000e+00> : vector<16x8x8xf32>
    %44 = tpu.matmul %15, %17, %cst_13 {dimension_numbers = #tpu.dot_dimension_numbers<[2], [2], [1], [1], [0, 0, 0, 1, 1, 1], [0], [0]>} : vector<16x8x1xf32>, vector<16x8x1xf32>, vector<16x8x8xf32> -> vector<16x8x8xf32>
    %cst_14 = arith.constant dense<0.000000e+00> : vector<16x8x8xf32>
    %45 = tpu.matmul %34, %43, %cst_14 {dimension_numbers = #tpu.dot_dimension_numbers<[2], [2], [1], [1], [0, 0, 0, 1, 1, 1], [0], [0]>} : vector<16x8x2xf32>, vector<16x8x2xf32>, vector<16x8x8xf32> -> vector<16x8x8xf32>
    "tpu.trace_stop"() : () -> ()
    %46 = arith.addf %44, %45 : vector<16x8x8xf32>
    %cst_15 = arith.constant dense<0xFF800000> : vector<16x8xf32>
    %47 = vector.multi_reduction <maximumf>, %46, %cst_15 [2] : vector<16x8x8xf32> to vector<16x8xf32>
    %48 = vector.shape_cast %47 : vector<16x8xf32> to vector<16x8x1xf32>
    %49 = vector.broadcast %48 : vector<16x8x1xf32> to vector<16x8x8xf32>
    %50 = arith.subf %46, %49 : vector<16x8x8xf32>
    %51 = math.exp %50 : vector<16x8x8xf32>
    %cst_16 = arith.constant dense<0.000000e+00> : vector<16x8xf32>
    %52 = vector.multi_reduction <add>, %51, %cst_16 [2] : vector<16x8x8xf32> to vector<16x8xf32>
    %53 = vector.shape_cast %52 : vector<16x8xf32> to vector<16x8x1xf32>
    %54 = tpu.reciprocal %53 {approx = true} : vector<16x8x1xf32> -> vector<16x8x1xf32>
    %55 = vector.broadcast %54 : vector<16x8x1xf32> to vector<16x8x8xf32>
    %56 = arith.mulf %51, %55 : vector<16x8x8xf32>
    "tpu.trace_start"() <{level = 10 : i32, message = "hqk,hkd->hqd"}> : () -> ()
    %cst_17 = arith.constant dense<0.000000e+00> : vector<16x8x2xf32>
    %57 = tpu.matmul %56, %23, %cst_17 {dimension_numbers = #tpu.dot_dimension_numbers<[2], [1], [1], [2], [0, 0, 0, 1, 1, 2], [0], [0]>} : vector<16x8x8xf32>, vector<16x8x2xf32>, vector<16x8x2xf32> -> vector<16x8x2xf32>
    "tpu.trace_stop"() : () -> ()
    %58 = tpu.transpose %57, [1, 0, 2] : vector<16x8x2xf32> -> vector<8x16x2xf32>
    %59 = vector.shape_cast %58 : vector<8x16x2xf32> to vector<8x32xf32>
    %c0_18 = arith.constant 0 : index
    %c0_19 = arith.constant 0 : index
    %60 = vector.load %arg6[%c0_18, %c0_19] : memref<32x32xf32, #tpu.memory_space<vmem>>, vector<32x32xf32>
    %cst_20 = arith.constant dense<0.000000e+00> : vector<8x32xf32>
    %61 = tpu.matmul %59, %60, %cst_20 {dimension_numbers = #tpu.dot_dimension_numbers<[1], [0], [0], [1], [0, 0, 1, 1], [], []>} : vector<8x32xf32>, vector<32x32xf32>, vector<8x32xf32> -> vector<8x32xf32>
    %c0_21 = arith.constant 0 : index
    %c0_22 = arith.constant 0 : index
    %c0_23 = arith.constant 0 : index
    %62 = vector.load %arg7[%c0_21, %c0_22, %c0_23] : memref<1x8x32xf32, #tpu.memory_space<vmem>>, vector<1x8x32xf32>
    %63 = vector.shape_cast %62 : vector<1x8x32xf32> to vector<8x32xf32>
    %64 = vector.shape_cast %61 : vector<8x32xf32> to vector<1x8x32xf32>
    tpu.vector_store %arg7[%c0_21, %c0_22, %c0_23], %64 {strides = array<i32>} : memref<1x8x32xf32, #tpu.memory_space<vmem>>, vector<1x8x32xf32>,
    return
  }
  func.func @transform_0(%arg0: i32) -> (i32, i32, i32) {
    %c0_i32 = arith.constant 0 : i32
    %c0_i32_0 = arith.constant 0 : i32
    %c0_i32_1 = arith.constant 0 : i32
    return %arg0, %c0_i32, %c0_i32_0 : i32, i32, i32
  }
  func.func @transform_1(%arg0: i32) -> (i32, i32) {
    %c0_i32 = arith.constant 0 : i32
    %c0_i32_0 = arith.constant 0 : i32
    %c0_i32_1 = arith.constant 0 : i32
    return %c0_i32, %c0_i32_0 : i32, i32
  }
  func.func @transform_2(%arg0: i32) -> (i32, i32) {
    %c0_i32 = arith.constant 0 : i32
    %c0_i32_0 = arith.constant 0 : i32
    %c0_i32_1 = arith.constant 0 : i32
    return %c0_i32, %c0_i32_0 : i32, i32
  }
  func.func @transform_3(%arg0: i32) -> (i32, i32) {
    %c0_i32 = arith.constant 0 : i32
    %c0_i32_0 = arith.constant 0 : i32
    %c0_i32_1 = arith.constant 0 : i32
    return %c0_i32, %c0_i32_0 : i32, i32
  }
  func.func @transform_4(%arg0: i32) -> (i32, i32) {
    %c0_i32 = arith.constant 0 : i32
    %c0_i32_0 = arith.constant 0 : i32
    %c0_i32_1 = arith.constant 0 : i32
    return %c0_i32, %c0_i32_0 : i32, i32
  }
  func.func @transform_5(%arg0: i32) -> (i32, i32) {
    %c0_i32 = arith.constant 0 : i32
    %c0_i32_0 = arith.constant 0 : i32
    %c0_i32_1 = arith.constant 0 : i32
    return %c0_i32, %c0_i32_0 : i32, i32
  }
  func.func @transform_6(%arg0: i32) -> (i32, i32, i32) {
    %c0_i32 = arith.constant 0 : i32
    %c0_i32_0 = arith.constant 0 : i32
    %c0_i32_1 = arith.constant 0 : i32
    return %arg0, %c0_i32, %c0_i32_0 : i32, i32, i32
  }
}

</mosaic_0001>

<bundles_post_ra>
// kernel: tpu_custom_call.1
= control target key start
LH: loop header
LB: loop body
LE: loop exit
PB: predicated region body
PF: predicated region fallthrough
CT: control target
= control target key end

     0   :  { %11 = vsyncpa [#allocation3], 0  ;;  %s10003_s0 = inlined_call_operand.vmem [shape: f32[2,8,32], index: 0, kind: input, shape index: {}]   ;;  %s10004_s1 = inlined_call_operand.vmem [shape: f32[8,2], index: 1, kind: input, shape index: {}]   ;;  %s10005_s2 = inlined_call_operand.vmem [shape: f32[8,2], index: 2, kind: input, shape index: {}]   ;;  %s10006_s3 = inlined_call_operand.hbm [shape: f32[32,32], index: 3, kind: input, shape index: {}]   ;;  %s10007_s4 = inlined_call_operand.hbm [shape: f32[16,80], index: 4, kind: input, shape index: {}]   ;;  %s10008_s5 = inlined_call_operand.hbm [shape: f32[32,32], index: 5, kind: input, shape index: {}]   ;;  %s10009_s6 = inlined_call_operand.hbm [shape: f32[2,8,32], index: 6, kind: output, shape index: {}]  }
   0x1   :  { %12 = vsyncpa [#allocation6], 0 }
   0x2   :  { %13 = vsyncpa [#allocation4], 0 }
   0x3   :  { %15 = vsyncpa [#allocation4 + $0x1], 0  ;;  %s8415_s21 = smov 0   ;;  %s8417_s22 = smov 0  }
   0x4   :  { %s8419_s23 = smov 0   ;;  %s8421_s24 = smov 0  }
   0x5 LB: > { %s8436_s25 = sadd.s32 4294967295, %s8337_s24   ;;  %s7509_s26 = sadd.s32 4294967294, %s8337_s24   ;;  %s8337_s24 = sphi %s8421_s24, %s10085_s24   ;;  %s8333_s23 = sphi %s8419_s23, %s10084_s23   ;;  %s8329_s22 = sphi %s8417_s22, %s10083_s22   ;;  %s8325_s21 = sphi %s8415_s21, %s10082_s21  }
   0x6   : > { %s8440_s27 = sadd.s32 1, %s8337_s24   ;;  %s159_s28 = sadd.s32 1, %s8333_s23 }
   0x7   : > { %s156_s29 = ssub.s32 %s8337_s24, %s8440_s27  ;;  %p169_p0 = scmp.ne.s32.totalorder %s8333_s23, %s8329_s22 }
   0x8   : > { %p157_p1 = scmp.eq.s32.totalorder %s156_s29, 0  ;;  %p170_p2 = scmp.eq.s32.totalorder %s8436_s25, 1 }
   0x9   : > { %p175_p3 = scmp.ne.s32.totalorder %s8329_s22, %s8325_s21  ;;  %p176_p4 = scmp.eq.s32.totalorder %s7509_s26, 1 }
   0xa   : > { %s8451_s30 = scalar_select %p157_p1, %s8333_s23, %s159_s28  }
   0xb   : > { %p8453_p5 = por %p170_p2, %p169_p0  ;;  %p8457_p6 = por %p176_p4, %p175_p3 }
   0xc   : > { %p7510_p7 = scmp.ge.s32.totalorder %s8337_s24, 1  ;;  %p183_p8 = scmp.lt.s32.totalorder %s8337_s24, 3 }
   0xd   : > { %s10023_s7 = scalar_select %p8453_p5, 1, 0 }
   0xe   : > { %s10024_s8 = scalar_select %p8457_p6, 1, 0 }
   0xf   : > { %p10010_p9 = scmp.eq.s32.totalorder %s8436_s25, 0  ;;  %p8464_p10 = pnand %p7510_p7, %p183_p8 }
  0x10   : > { %s8339_s10 = smov [#allocation5]   ;;  %s8340_s13 = smov [#allocation2]  }
  0x11   : > { %p8032_p11 = pneg %p8464_p10  ;;  %s214_s11 = sshll.u32 %s8339_s10, 4  ;;  %s215_s11 = int_to_ptr.vmem [resolvable:$true] %s214_s11 }
  0x12   : > { %s201_s14 = sshll.u32 %s8340_s13, 4  ;;  %s8341_s15 = smov [#allocation7]   ;;  %s202_s14 = int_to_ptr.vmem [resolvable:$true] %s201_s14 }
  0x13   : > { %p8472_p12 = pnand %p10010_p9, %p8032_p11  ;;  %s227_s16 = sshll.u32 %s8341_s15, 4  ;;  %s228_s16 = int_to_ptr.vmem [resolvable:$true] %s227_s16 }
  0x14   : > { %s8202_s17 = scalar_lea.vmem %s215_s11, 256  ;;  %p8210_p3 = scmp.lt.s32.totalorder %s215_s11, %s215_s11 }
  0x15   : > { %p8193_p13 = pneg %p8472_p12  ;;  %p8203_p0 = scmp.ne.s32.totalorder %s215_s11, %s8202_s17 }
  0x16   : > { %p8211_p4 = scmp.lt.s32.totalorder %s8202_s17, %s8202_s17 }
  0x17   : > { %p8205_p1 = pnand %p8203_p0, %p8193_p13 }
  0x18   : > { %p8212_p7 = por %p8211_p4, %p8210_p3 }
  0x19   : > { %p8206_p2 = pneg %p8205_p1 }
  0x1b   : > { %p8213_p8 = pnand %p8212_p7, %p8206_p2 }
  0x1d   : > { %8216 = shalt.err (!%p8213_p8)
}
  0x1e   : > { %s8342_s18 = smov 128   ;;  %s8343_s19 = smov 8  }
  0x1f   : > { %8038 = dma.hbm_to_vmem [thread:$0]  (!%p8472_p12), %s10007_s4, 256, %s215_s11, [#allocation6], %s8342_s18, %s8342_s18, %s8343_s19  }
  0x20   : > { %s8228_s28 = scalar_lea.vmem %s202_s14, 512  ;;  %p8236_p9 = scmp.lt.s32.totalorder %s202_s14, %s202_s14 }
  0x21   : > { %p8229_p11 = scmp.ne.s32.totalorder %s202_s14, %s8228_s28  ;;  %p8237_p6 = scmp.lt.s32.totalorder %s8228_s28, %s8228_s28 }
  0x23   : > { %p8231_p0 = pnand %p8229_p11, %p8193_p13  ;;  %p8238_p3 = por %p8237_p6, %p8236_p9 }
  0x25   : > { %p8232_p1 = pneg %p8231_p0 }
  0x27   : > { %p8239_p2 = pnand %p8238_p3, %p8232_p1 }
  0x29   : > { %8242 = shalt.err (!%p8239_p2)
}
  0x2a   : > { %8035 = dma.hbm_to_vmem [thread:$0]  (!%p8472_p12), %s10006_s3, 512, %s202_s14, [#allocation3], %s8342_s18, %s8342_s18, %s8343_s19  }
  0x2b   : > { %s8254_s11 = scalar_lea.vmem %s228_s16, 512  ;;  %p8262_p11 = scmp.lt.s32.totalorder %s228_s16, %s228_s16 }
  0x2c   : > { %p8255_p4 = scmp.ne.s32.totalorder %s228_s16, %s8254_s11  ;;  %p8263_p0 = scmp.lt.s32.totalorder %s8254_s11, %s8254_s11 }
  0x2e   : > { %p8257_p7 = pnand %p8255_p4, %p8193_p13  ;;  %p8264_p5 = por %p8263_p0, %p8262_p11 }
  0x30   : > { %p8258_p8 = pneg %p8257_p7 }
  0x32   : > { %p8265_p6 = pnand %p8264_p5, %p8258_p8 }
  0x34   : > { %8268 = shalt.err (!%p8265_p6)
}
  0x35   : > { %8041 = dma.hbm_to_vmem [thread:$0]  (!%p8472_p12), %s10008_s5, 512, %s228_s16, [#allocation6], %s8342_s18, %s8342_s18, %s8343_s19  }
  0x36   : > { %250 = sbr.rel (%p8464_p10) target bundleno = 1905 (0x771), region = 44 }
  0x3b   : > { %p10027_p9 = scmp.eq.s32.totalorder %s8436_s25, 0 }
  0x3d   : > { %8312 = dma.done.wait (%p10027_p9), [#allocation3], 512   ;;  %p10028_p13 = pmov %p10027_p9 }
  0x3e   : > { %p10029_p1 = pmov %p10027_p9 }
  0x3f   : > { %8314 = vsyncadd (%p10028_p13), [#allocation3], 4294966784 }
  0x40   : > { %8316 = dma.done.wait (%p10029_p1), [#allocation6], 768   ;;  %p10030_p5 = pmov %p10029_p1 }
  0x41   : > { %p287_p3 = scmp.lt.s32.totalorder %s8436_s25, 1  ;;  %v10012_v0 = vmov 0.0   ;;  %vm8345_vm0 = vmmov 0   ;;  %v297_v1 = vld [vmem:[#allocation2 + $0x18] sm:$0xff]  ;;  %v296_v2 = vld [vmem:[#allocation2 + $0x10] sm:$0xff]  ;;  %v373_v3 = vld [vmem:[#allocation5 + $0x8] sm:$0xff]  ;;  %v448_v8 = vlaneseq }
  0x42   : > { %8318 = vsyncadd (%p10030_p5), [#allocation6], 4294966528  ;;  %7749 = vmatprep.subr.mxu0 %v10012_v0  ;;  %7757 = vmatprep.mubr.msk.f32.mxu0 %vm8345_vm0, %v10012_v0  ;;  %v295_v4 = vld [vmem:[#allocation2 + $0x8] sm:$0xff]  ;;  %v294_v5 = vld [vmem:[#allocation2] sm:$0xff]  ;;  %vm298_vm1 = vcmask 261120   ;;  %vm374_vm2 = vcmask 130048  }
  0x43   : > { %s288_s9 = scalar_select %p287_p3, %s8436_s25, 1  ;;  %7760 = vmatprep.subr.mxu1 %v10012_v0  ;;  %7764 = vmatprep.mubr.msk.f32.mxu1 %vm8345_vm0, %v10012_v0  ;;  %v372_v7 = vld [vmem:[#allocation5] sm:$0xff]  ;;  %v8532_v9 = vshrl.u32 %v448_v8, 7  ;;  %v8346_v26 = vmov 0   ;;  %v8347_v31 = vmov 1983009808  }
  0x44   : > { %7750 = vmatpush3.msra.mxu0 %v297_v1  ;;  %7761 = vmatpush3.msra.mxu1 %v373_v3  ;;  %v547_v32 = vunpack.c.l.s4 %v8347_v31  ;;  %v8348_v36 = vmov 1934713408   ;;  %vm2917_vm3 = vcmask 15360   ;;  %s8349_s28 = smov 126   ;;  %s8350_s29 = smov 124   ;;  %vm4134_vm4 = vcmask 7168  }
  0x45   : > { %s7520_s12 = sshll.u32 %s288_s9, 3  ;;  %7751 = vmatprep.subr.mxu0 %v10012_v0  ;;  %7762 = vmatprep.subr.mxu1 %v10012_v0  ;;  %v474_v10 = vsub.s32 2, %v8532_v9  ;;  %v450_v11 = vsub.s32 0, %v8532_v9  ;;  %v486_v15 = vsub.s32 3, %v8532_v9  ;;  %v462_v16 = vsub.s32 1, %v8532_v9  ;;  %s8351_s10 = smov 120  }
  0x46   : > { %s290_s17 = scalar_lea.vmem %s10003_s0, %s7520_s12  ;;  %7752 = vmatpush3.msra.mxu0 %v296_v2  ;;  %7763 = vmatpush3.msra.mxu1 %v372_v7  ;;  %v510_v20 = vsub.s32 5, %v8532_v9  ;;  %v498_v21 = vsub.s32 4, %v8532_v9  ;;  %v534_v24 = vsub.s32 7, %v8532_v9  ;;  %v522_v25 = vsub.s32 6, %v8532_v9  ;;  %s8352_s11 = smov 122  }
  0x47   : > { %7753 = vmatprep.subr.mxu0 %v10012_v0  ;;  %v291_v6 = vld [vmem:[%s290_s17] sm:$0xff]  ;;  %7767 = vmatprep.subr.mxu1 %v10012_v0  ;;  %v548_v35 = vunpack.c.0.s8 %v547_v32  ;;  %v611_v37 = vunpack.c.l.s4 %v8348_v36  ;;  %s8353_s13 = smov 116   ;;  %s8354_s15 = smov 118   ;;  %vm5351_vm5 = vcmask 64512   ;;  %vm7301_vm6 = vcmask 31744  }
  0x48   : > { %7754 = vmatpush3.msra.mxu0 %v295_v4  ;;  %8126 = vset.pattern.permute.xlu1 %v8346_v26  ;;  %s8355_s9 = smov 112   ;;  %s8356_s12 = smov 114   ;;  %vm7303_vm7 = vcmask 48128   ;;  %vm7306_vm8 = vcmask 80896   ;;  %vm7308_vm9 = vcmask 97280   ;;  %vm7310_vm10 = vcmask 113664  }
  0x49   : > { %7755 = vmatprep.subr.mxu0 %v10012_v0  ;;  %8125 = vset.pattern.permute.xlu0 %v8346_v26  ;;  %v8562_v41 = vsub.s32 %v548_v35, %v8532_v9  ;;  %v612_v43 = vunpack.c.0.s8 %v611_v37  ;;  %s8357_s14 = smov 108   ;;  %s8358_s16 = smov 110   ;;  %vm7313_vm11 = vcmask 146432   ;;  %vm7315_vm12 = vcmask 162816  }
  0x4a   : > { %7756 = vmatpush3.msra.mxu0 %v294_v5  ;;  %s8359_s17 = smov 104   ;;  %s8360_s18 = smov 106   ;;  %vm7317_vm13 = vcmask 179200   ;;  %vm7319_vm14 = vcmask 195584   ;;  %vm7321_vm15 = vcmask 211968  }
  0x4b   : > { %7758 = vmatmul.mubr.msk.f32.vlgmr.msra.gmra.mxu0 %vm298_vm1, %v291_v6  ;;  %7772 = vmatprep.subr.mxu0 %v10012_v0  ;;  %v8569_v54 = vsub.s32 %v612_v43, %v8532_v9  ;;  %s8361_s19 = smov 100   ;;  %s8362_s20 = smov 102  }
  0x4c   : > { %7774 = vmatprep.mubr.msk.f32.mxu0 %vm8345_vm0, %v10012_v0  ;;  %s8363_s26 = smov 98   ;;  %p10080_p12 = scmp.ne.s32.totalorder %s10023_s7, 0 }
  0x4d   : > { %10031 = vst [vmem:[#allocation12_spill] sm:$0xff] %v8569_v54 }
 0x10b   : > { %v368_v12 = vpop.f32.mrf.mxu0 }
 0x10c   : > { %7765 = vmatmul.mubr.msk.f32.vlgmr.msra.gmra.mxu1 %vm374_vm2, %v368_v12  ;;  %v1507_v13 = vrot.slane %v368_v12, %v474_v10  ;;  %v1483_v14 = vrot.slane %v368_v12, %v450_v11  ;;  %v1519_v18 = vrot.slane %v368_v12, %v486_v15  ;;  %v1495_v19 = vrot.slane %v368_v12, %v462_v16 }
 0x10d   : > { %v7759_v17 = vpop.f32.mrf.mxu0  ;;  %7769 = vmatprep.mubr.msk.f32.mxu1 %vm8345_vm0, %v10012_v0  ;;  %v1543_v22 = vrot.slane %v368_v12, %v510_v20  ;;  %v1531_v23 = vrot.slane %v368_v12, %v498_v21  ;;  %v1567_v27 = vrot.slane %v368_v12, %v534_v24  ;;  %v1555_v28 = vrot.slane %v368_v12, %v522_v25 }
 0x10e   : > { %1510 = vbcast.lane.b32.xlu1 %v1507_v13, 272  ;;  %1486 = vbcast.lane.b32.xlu0 %v1483_v14, 272 }
 0x112   : > { %1522 = vbcast.lane.b32.xlu1 %v1519_v18, 272  ;;  %1498 = vbcast.lane.b32.xlu0 %v1495_v19, 272 }
 0x116   : > { %1546 = vbcast.lane.b32.xlu1 %v1543_v22, 272  ;;  %1534 = vbcast.lane.b32.xlu0 %v1531_v23, 272 }
 0x11a   : > { %1570 = vbcast.lane.b32.xlu1 %v1567_v27, 272  ;;  %1558 = vbcast.lane.b32.xlu0 %v1555_v28, 272 }
 0x11e   : > { %1502 = vbcast.lane.b32.xlu1 %v1495_v19, 280  ;;  %1490 = vbcast.lane.b32.xlu0 %v1483_v14, 280 }
 0x122   : > { %1526 = vbcast.lane.b32.xlu1 %v1519_v18, 280  ;;  %1514 = vbcast.lane.b32.xlu0 %v1507_v13, 280 }
 0x126   : > { %1550 = vbcast.lane.b32.xlu1 %v1543_v22, 280  ;;  %1538 = vbcast.lane.b32.xlu0 %v1531_v23, 280 }
 0x12a   : > { %1574 = vbcast.lane.b32.xlu1 %v1567_v27, 280  ;;  %1562 = vbcast.lane.b32.xlu0 %v1555_v28, 280 }
 0x180   : > { %v1511_v29 = vpop.permute.xlu1 %1510  ;;  %v1487_v30 = vpop.permute.xlu0 %1486 }
 0x181   : > { %v1576_v42 = vcombine.low %v1487_v30, %v1511_v29  ;;  %v1577_v59 = vcombine.high %v1487_v30, %v1511_v29 }
 0x183   : > { %v1584_v49 = vrot.slane %v1576_v42, %v8562_v41  ;;  %v1591_v7 = vrot.slane %v1577_v59, %v8562_v41 }
 0x184   : > { %v1523_v33 = vpop.permute.xlu1 %1522  ;;  %v1499_v34 = vpop.permute.xlu0 %1498 }
 0x185   : > { %v1592_v38 = vcombine.low %v1499_v34, %v1523_v33  ;;  %v1593_v55 = vcombine.high %v1499_v34, %v1523_v33 }
 0x187   : > { %v1600_v44 = vrot.slane %v1592_v38, %v8562_v41  ;;  %v1607_v2 = vrot.slane %v1593_v55, %v8562_v41 }
 0x188   : > { %v1547_v39 = vpop.permute.xlu1 %1546  ;;  %v1535_v40 = vpop.permute.xlu0 %1534 }
 0x189   : > { %v1640_v56 = vcombine.low %v1584_v49, %v1600_v44  ;;  %v1641_v3 = vcombine.high %v1584_v49, %v1600_v44  ;;  %v1656_v19 = vcombine.low %v1591_v7, %v1607_v2  ;;  %v1657_v31 = vcombine.high %v1591_v7, %v1607_v2 }
 0x18b   : > { %v1648_v6 = vrot.slane %v1640_v56, %v8569_v54  ;;  %v1655_v26 = vrot.slane %v1641_v3, %v8569_v54  ;;  %v1664_v36 = vrot.slane %v1656_v19, %v8569_v54 }
 0x18c   : > { %v1571_v45 = vpop.permute.xlu1 %1570  ;;  %v1559_v46 = vpop.permute.xlu0 %1558 }
 0x18d   : > { %v1624_v47 = vcombine.low %v1547_v39, %v1571_v45  ;;  %v1608_v48 = vcombine.low %v1535_v40, %v1559_v46  ;;  %v1625_v50 = vcombine.high %v1547_v39, %v1571_v45  ;;  %v1609_v51 = vcombine.high %v1535_v40, %v1559_v46 }
 0x18f   : > { %v1632_v52 = vrot.slane %v1624_v47, %v8562_v41  ;;  %v1616_v53 = vrot.slane %v1608_v48, %v8562_v41  ;;  %v1639_v61 = vrot.slane %v1625_v50, %v8562_v41  ;;  %v1623_v62 = vrot.slane %v1609_v51, %v8562_v41 }
 0x190   : > { %v1503_v57 = vpop.permute.xlu1 %1502  ;;  %v1491_v58 = vpop.permute.xlu0 %1490  ;;  %v1671_v48 = vrot.slane %v1657_v31, %v8569_v54 }
 0x191   : > { %v1672_v60 = vcombine.low %v1616_v53, %v1632_v52  ;;  %v1673_v63 = vcombine.high %v1616_v53, %v1632_v52  ;;  %v1688_v8 = vcombine.low %v1623_v62, %v1639_v61  ;;  %v1689_v27 = vcombine.high %v1623_v62, %v1639_v61 }
 0x193   : > { %v1680_v1 = vrot.slane %v1672_v60, %v8569_v54  ;;  %v1687_v14 = vrot.slane %v1673_v63, %v8569_v54  ;;  %v1696_v30 = vrot.slane %v1688_v8, %v8569_v54  ;;  %v1703_v39 = vrot.slane %v1689_v27, %v8569_v54 }
 0x194   : > { %v1527_v4 = vpop.permute.xlu1 %1526  ;;  %v1515_v5 = vpop.permute.xlu0 %1514 }
 0x195   : > { %v8577_v12 = vcombine.high %v1648_v6, %v1680_v1  ;;  %v8579_v13 = vcombine.low %v1648_v6, %v1680_v1  ;;  %v1728_v17 = vcombine.low %v1503_v57, %v1527_v4  ;;  %v1712_v18 = vcombine.low %v1491_v58, %v1515_v5 }
 0x196   : > { %v8585_v28 = vcombine.low %v1655_v26, %v1687_v14  ;;  %v8587_v29 = vcombine.high %v1655_v26, %v1687_v14  ;;  %v1708_v43 = vcombine.low %v1664_v36, %v1696_v30  ;;  %v1709_v44 = vcombine.high %v1664_v36, %v1696_v30 }
 0x197   : > { %2700 = vperm.xlu1 %8126, %v8577_v12   ;;  %2695 = vperm.xlu0 %8125, %v8579_v13   ;;  %v1736_v32 = vrot.slane %v1728_v17, %v8562_v41  ;;  %v1720_v33 = vrot.slane %v1712_v18, %v8562_v41  ;;  %v1729_v49 = vcombine.high %v1503_v57, %v1527_v4  ;;  %v2790_v31 = vsub.f32 0.0, %v8577_v12 }
 0x198   : > { %v1551_v22 = vpop.permute.xlu1 %1550  ;;  %v1539_v23 = vpop.permute.xlu0 %1538  ;;  %v1713_v50 = vcombine.high %v1491_v58, %v1515_v5  ;;  %v1710_v52 = vcombine.low %v1671_v48, %v1703_v39  ;;  %v1711_v59 = vcombine.high %v1671_v48, %v1703_v39  ;;  %v2793_v36 = vsub.f32 0.0, %v1708_v43 }
 0x199   : > { %v1776_v45 = vcombine.low %v1720_v33, %v1736_v32  ;;  %v1743_v62 = vrot.slane %v1729_v49, %v8562_v41  ;;  %v1777_v57 = vcombine.high %v1720_v33, %v1736_v32  ;;  %v2789_v32 = vsub.f32 0.0, %v8579_v13 }
 0x19a   : > { %v1727_v63 = vrot.slane %v1713_v50, %v8562_v41  ;;  %v2792_v33 = vsub.f32 0.0, %v8587_v29 }
 0x19b   : > { %2705 = vperm.xlu1 %8126, %v8585_v28   ;;  %2710 = vperm.xlu0 %8125, %v8587_v29   ;;  %v1784_v60 = vrot.slane %v1776_v45, %v8569_v54  ;;  %v1791_v5 = vrot.slane %v1777_v57, %v8569_v54  ;;  %v8726_v57 = vld [vmem:[%s10004_s1] sm:$0xff] }
 0x19c   : > { %v1575_v34 = vpop.permute.xlu1 %1574  ;;  %v1563_v35 = vpop.permute.xlu0 %1562  ;;  %v1792_v4 = vcombine.low %v1727_v63, %v1743_v62  ;;  %v1793_v17 = vcombine.high %v1727_v63, %v1743_v62 }
 0x19d   : > { %v1760_v37 = vcombine.low %v1551_v22, %v1575_v34  ;;  %v1744_v38 = vcombine.low %v1539_v23, %v1563_v35  ;;  %v1761_v40 = vcombine.high %v1551_v22, %v1575_v34  ;;  %v1745_v42 = vcombine.high %v1539_v23, %v1563_v35 }
 0x19e   : > { %v1800_v18 = vrot.slane %v1792_v4, %v8569_v54  ;;  %v1807_v26 = vrot.slane %v1793_v17, %v8569_v54  ;;  %v2791_v34 = vsub.f32 0.0, %v8585_v28  ;;  %v2794_v35 = vsub.f32 0.0, %v1709_v44 }
 0x19f   : > { %v1768_v46 = vrot.slane %v1760_v37, %v8562_v41  ;;  %v1752_v47 = vrot.slane %v1744_v38, %v8562_v41  ;;  %2715 = vperm.xlu1 %8126, %v1708_v43   ;;  %2720 = vperm.xlu0 %8125, %v1709_v44   ;;  %v1775_v53 = vrot.slane %v1761_v40, %v8562_v41  ;;  %v2796_v37 = vsub.f32 0.0, %v1711_v59 }
 0x1a0   : > { %v1759_v55 = vrot.slane %v1745_v42, %v8562_v41  ;;  %v2795_v38 = vsub.f32 0.0, %v1710_v52 }
 0x1a1   : > { %v1808_v51 = vcombine.low %v1752_v47, %v1768_v46  ;;  %v1809_v56 = vcombine.high %v1752_v47, %v1768_v46 }
 0x1a2   : > { %v1824_v2 = vcombine.low %v1759_v55, %v1775_v53  ;;  %v1825_v6 = vcombine.high %v1759_v55, %v1775_v53 }
 0x1a3   : > { %v1816_v61 = vrot.slane %v1808_v51, %v8569_v54  ;;  %2725 = vperm.xlu1 %8126, %v1710_v52   ;;  %2730 = vperm.xlu0 %8125, %v1711_v59   ;;  %v1823_v3 = vrot.slane %v1809_v56, %v8569_v54 }
 0x1a4   : > { %v1832_v14 = vrot.slane %v1824_v2, %v8569_v54  ;;  %v1839_v23 = vrot.slane %v1825_v6, %v8569_v54 }
 0x1a5   : > { %v1841_v58 = vcombine.high %v1784_v60, %v1816_v61  ;;  %v1840_v1 = vcombine.low %v1784_v60, %v1816_v61  ;;  %v1843_v7 = vcombine.high %v1791_v5, %v1823_v3  ;;  %v1842_v8 = vcombine.low %v1791_v5, %v1823_v3 }
 0x1a6   : > { %v1845_v19 = vcombine.high %v1800_v18, %v1832_v14  ;;  %v1844_v22 = vcombine.low %v1800_v18, %v1832_v14  ;;  %v1847_v27 = vcombine.high %v1807_v26, %v1839_v23  ;;  %v1846_v30 = vcombine.low %v1807_v26, %v1839_v23 }
 0x1a7   : > { %2740 = vperm.xlu0 %8125, %v1841_v58   ;;  %2735 = vperm.xlu1 %8126, %v1840_v1   ;;  %v2798_v39 = vsub.f32 0.0, %v1841_v58  ;;  %v2797_v12 = vsub.f32 0.0, %v1840_v1  ;;  %v2800_v13 = vsub.f32 0.0, %v1843_v7  ;;  %v2799_v40 = vsub.f32 0.0, %v1842_v8  ;;  %v8731_v58 = vld [vmem:[%s10005_s2] sm:$0xff] }
 0x1a8   : > { %v2802_v42 = vsub.f32 0.0, %v1845_v19  ;;  %v2801_v44 = vsub.f32 0.0, %v1844_v22  ;;  %v2804_v43 = vsub.f32 0.0, %v1847_v27  ;;  %v2803_v45 = vsub.f32 0.0, %v1846_v30 }
 0x1ab   : > { %2750 = vperm.xlu0 %8125, %v1843_v7   ;;  %2745 = vperm.xlu1 %8126, %v1842_v8  }
 0x1af   : > { %2760 = vperm.xlu0 %8125, %v1845_v19   ;;  %2755 = vperm.xlu1 %8126, %v1844_v22  }
 0x1b3   : > { %2770 = vperm.xlu0 %8125, %v1847_v27   ;;  %2765 = vperm.xlu1 %8126, %v1846_v30  }
 0x1b7   : > { %2812 = vperm.xlu0 %8125, %v2790_v31   ;;  %2807 = vperm.xlu1 %8126, %v2789_v32  }
 0x1bb   : > { %2822 = vperm.xlu0 %8125, %v2792_v33   ;;  %2817 = vperm.xlu1 %8126, %v2791_v34  }
 0x1bf   : > { %2832 = vperm.xlu0 %8125, %v2794_v35   ;;  %2827 = vperm.xlu1 %8126, %v2793_v36  }
 0x1c3   : > { %2842 = vperm.xlu0 %8125, %v2796_v37   ;;  %2837 = vperm.xlu1 %8126, %v2795_v38  }
 0x1c7   : > { %2852 = vperm.xlu0 %8125, %v2798_v39   ;;  %2847 = vperm.xlu1 %8126, %v2797_v12  }
 0x1cb   : > { %2862 = vperm.xlu0 %8125, %v2800_v13   ;;  %2857 = vperm.xlu1 %8126, %v2799_v40  }
 0x1cc   : > { %v8615_v29 = vpop.f32.mrf.mxu1 }
 0x1cd   : > { %v8620_v46 = vrot.slane %v8615_v29, %v462_v16  ;;  %v8625_v47 = vrot.slane %v8615_v29, %v450_v11  ;;  %v8632_v48 = vrot.slane %v8615_v29, %v486_v15  ;;  %v8637_v49 = vrot.slane %v8615_v29, %v474_v10 }
 0x1ce   : > { %v7766_v28 = vpop.f32.mrf.mxu1  ;;  %v8644_v11 = vrot.slane %v8615_v29, %v510_v20  ;;  %v8649_v16 = vrot.slane %v8615_v29, %v498_v21  ;;  %v8656_v10 = vrot.slane %v8615_v29, %v534_v24  ;;  %v8661_v15 = vrot.slane %v8615_v29, %v522_v25 }
 0x1cf   : > { %2872 = vperm.xlu0 %8125, %v2802_v42   ;;  %2867 = vperm.xlu1 %8126, %v2801_v44  }
 0x1d3   : > { %2882 = vperm.xlu0 %8125, %v2804_v43   ;;  %2877 = vperm.xlu1 %8126, %v2803_v45  }
 0x1d7   : > { %1154 = vbcast.lane.b32.xlu1 %v8620_v46, 320  ;;  %1146 = vbcast.lane.b32.xlu0 %v8625_v47, 320 }
 0x1db   : > { %1170 = vbcast.lane.b32.xlu1 %v8632_v48, 320  ;;  %1162 = vbcast.lane.b32.xlu0 %v8637_v49, 320 }
 0x1df   : > { %1186 = vbcast.lane.b32.xlu1 %v8644_v11, 320  ;;  %1178 = vbcast.lane.b32.xlu0 %v8649_v16, 320 }
 0x1e3   : > { %1202 = vbcast.lane.b32.xlu1 %v8656_v10, 320  ;;  %1194 = vbcast.lane.b32.xlu0 %v8661_v15, 320 }
 0x1e7   : > { %1158 = vbcast.lane.b32.xlu1 %v8620_v46, 328  ;;  %1150 = vbcast.lane.b32.xlu0 %v8625_v47, 328 }
 0x1eb   : > { %1174 = vbcast.lane.b32.xlu1 %v8632_v48, 328  ;;  %1166 = vbcast.lane.b32.xlu0 %v8637_v49, 328 }
 0x1ef   : > { %1190 = vbcast.lane.b32.xlu1 %v8644_v11, 328  ;;  %1182 = vbcast.lane.b32.xlu0 %v8649_v16, 328 }
 0x1f3   : > { %1206 = vbcast.lane.b32.xlu1 %v8656_v10, 328  ;;  %1198 = vbcast.lane.b32.xlu0 %v8661_v15, 328 }
 0x1f7   : > { %817 = vbcast.lane.b32.xlu1 %v8625_v47, 256  ;;  %824 = vbcast.lane.b32.xlu0 %v8620_v46, 256 }
 0x1fb   : > { %831 = vbcast.lane.b32.xlu1 %v8637_v49, 256  ;;  %838 = vbcast.lane.b32.xlu0 %v8632_v48, 256 }
 0x1ff   : > { %845 = vbcast.lane.b32.xlu1 %v8649_v16, 256  ;;  %852 = vbcast.lane.b32.xlu0 %v8644_v11, 256 }
 0x203   : > { %859 = vbcast.lane.b32.xlu1 %v8661_v15, 256  ;;  %866 = vbcast.lane.b32.xlu0 %v8656_v10, 256 }
 0x207   : > { %454 = vbcast.lane.b32.xlu1 %v8625_v47, 304  ;;  %466 = vbcast.lane.b32.xlu0 %v8620_v46, 304 }
 0x20b   : > { %478 = vbcast.lane.b32.xlu1 %v8637_v49, 304  ;;  %490 = vbcast.lane.b32.xlu0 %v8632_v48, 304 }
 0x20f   : > { %502 = vbcast.lane.b32.xlu1 %v8649_v16, 304  ;;  %514 = vbcast.lane.b32.xlu0 %v8644_v11, 304 }
 0x212   : > { %v2701_v9 = vpop.permute.xlu1 %2700  ;;  %v2696_v20 = vpop.permute.xlu0 %2695 }
 0x213   : > { %526 = vbcast.lane.b32.xlu1 %v8661_v15, 304  ;;  %538 = vbcast.lane.b32.xlu0 %v8656_v10, 304  ;;  %v2774_v3 = vmul.f32 %v2701_v9, %v8726_v57  ;;  %v2773_v4 = vmul.f32 %v2696_v20, %v8726_v57 }
 0x216   : > { %v8689_v21 = vpop.permute.xlu1 %2705  ;;  %v8691_v24 = vpop.permute.xlu0 %2710 }
 0x217   : > { %821 = vbcast.lane.b32.xlu1 %v8625_v47, 264  ;;  %828 = vbcast.lane.b32.xlu0 %v8620_v46, 264 }
 0x21a   : > { %v8695_v25 = vpop.permute.xlu1 %2715  ;;  %v8697_v50 = vpop.permute.xlu0 %2720 }
 0x21b   : > { %835 = vbcast.lane.b32.xlu1 %v8637_v49, 264  ;;  %842 = vbcast.lane.b32.xlu0 %v8632_v48, 264 }
 0x21e   : > { %v8701_v51 = vpop.permute.xlu1 %2725  ;;  %v8703_v52 = vpop.permute.xlu0 %2730 }
 0x21f   : > { %849 = vbcast.lane.b32.xlu1 %v8649_v16, 264  ;;  %856 = vbcast.lane.b32.xlu0 %v8644_v11, 264 }
 0x222   : > { %v8707_v53 = vpop.permute.xlu1 %2735  ;;  %v8709_v55 = vpop.permute.xlu0 %2740 }
 0x226   : > { %v8711_v56 = vpop.permute.xlu1 %2745  ;;  %v8713_v59 = vpop.permute.xlu0 %2750 }
 0x22a   : > { %v8715_v60 = vpop.permute.xlu1 %2755  ;;  %v8717_v61 = vpop.permute.xlu0 %2760 }
 0x22e   : > { %v8719_v62 = vpop.permute.xlu1 %2765  ;;  %v8721_v63 = vpop.permute.xlu0 %2770 }
 0x22f   : > { %10032 = vst [vmem:[#allocation13_spill] sm:$0xff] %v8721_v63 }
 0x232   : > { %v2808_v1 = vpop.permute.xlu1 %2807  ;;  %v2813_v2 = vpop.permute.xlu0 %2812 }
 0x233   : > { %v2885_v5 = vmul.f32 %v2808_v1, %v8731_v58  ;;  %v2886_v6 = vmul.f32 %v2813_v2, %v8731_v58 }
 0x235   : > { %v2901_v7 = vadd.f32 %v2885_v5, %v2773_v4  ;;  %v2902_v8 = vadd.f32 %v2886_v6, %v2774_v3 }
 0x236   : > { %v8737_v14 = vpop.permute.xlu1 %2817  ;;  %v8739_v17 = vpop.permute.xlu0 %2822 }
 0x237   : > { %7768 = vmatpush3.xpose.msk.msra.mxu1 %vm2917_vm3, %v2901_v7  ;;  %7773 = vmatpush3.xpose.msk.msra.mxu0 %vm2917_vm3, %v2902_v8 }
 0x238   : > { %7777 = vmatprep.subr.mxu1 %v10012_v0  ;;  %7782 = vmatprep.subr.mxu0 %v10012_v0 }
 0x23a   : > { %v8745_v18 = vpop.permute.xlu1 %2827  ;;  %v8747_v19 = vpop.permute.xlu0 %2832 }
 0x23e   : > { %v8749_v22 = vpop.permute.xlu1 %2837  ;;  %v8751_v23 = vpop.permute.xlu0 %2842 }
 0x23f   : > { %10033 = vst [vmem:[#allocation14_spill] sm:$0xff] %v8749_v22  ;;  %10034 = vst [vmem:[#allocation15_spill] sm:$0xff] %v8751_v23 }
 0x242   : > { %v8753_v26 = vpop.permute.xlu1 %2847  ;;  %v8755_v27 = vpop.permute.xlu0 %2852 }
 0x243   : > { %10035 = vst [vmem:[#allocation16_spill] sm:$0xff] %v8753_v26  ;;  %10036 = vst [vmem:[#allocation17_spill] sm:$0xff] %v8755_v27 }
 0x246   : > { %v8757_v30 = vpop.permute.xlu1 %2857  ;;  %v8759_v31 = vpop.permute.xlu0 %2862 }
 0x247   : > { %10037 = vst [vmem:[#allocation18_spill] sm:$0xff] %v8757_v30  ;;  %10038 = vst [vmem:[#allocation19_spill] sm:$0xff] %v8759_v31 }
 0x24a   : > { %v8761_v32 = vpop.permute.xlu1 %2867  ;;  %v8763_v33 = vpop.permute.xlu0 %2872 }
 0x24b   : > { %10039 = vst [vmem:[#allocation20_spill] sm:$0xff] %v8761_v32  ;;  %10040 = vst [vmem:[#allocation21_spill] sm:$0xff] %v8763_v33 }
 0x24e   : > { %v8765_v34 = vpop.permute.xlu1 %2877  ;;  %v8767_v35 = vpop.permute.xlu0 %2882 }
 0x24f   : > { %10041 = vst [vmem:[#allocation22_spill] sm:$0xff] %v8765_v34  ;;  %10042 = vst [vmem:[#allocation23_spill] sm:$0xff] %v8767_v35 }
 0x252   : > { %v1155_v36 = vpop.permute.xlu1 %1154  ;;  %v1147_v37 = vpop.permute.xlu0 %1146 }
 0x256   : > { %v1171_v38 = vpop.permute.xlu1 %1170  ;;  %v1163_v39 = vpop.permute.xlu0 %1162 }
 0x257   : > { %v1224_v12 = vcombine.low %v1155_v36, %v1171_v38  ;;  %v1208_v13 = vcombine.low %v1147_v37, %v1163_v39  ;;  %v1225_v3 = vcombine.high %v1155_v36, %v1171_v38  ;;  %v1209_v4 = vcombine.high %v1147_v37, %v1163_v39 }
 0x259   : > { %v1232_v42 = vrot.slane %v1224_v12, %v8562_v41  ;;  %v1216_v44 = vrot.slane %v1208_v13, %v8562_v41  ;;  %v1239_v33 = vrot.slane %v1225_v3, %v8562_v41 }
 0x25a   : > { %v1187_v40 = vpop.permute.xlu1 %1186  ;;  %v1179_v28 = vpop.permute.xlu0 %1178 }
 0x25b   : > { %v1272_v7 = vcombine.low %v1216_v44, %v1232_v42  ;;  %v1273_v37 = vcombine.high %v1216_v44, %v1232_v42 }
 0x25d   : > { %v1287_v44 = vrot.slane %v1273_v37, %v8569_v54 }
 0x25e   : > { %v1203_v43 = vpop.permute.xlu1 %1202  ;;  %v1195_v45 = vpop.permute.xlu0 %1194 }
 0x25f   : > { %v1256_v9 = vcombine.low %v1187_v40, %v1203_v43  ;;  %v1240_v20 = vcombine.low %v1179_v28, %v1195_v45  ;;  %v1257_v1 = vcombine.high %v1187_v40, %v1203_v43  ;;  %v1241_v2 = vcombine.high %v1179_v28, %v1195_v45 }
 0x260   : > { %v1223_v40 = vrot.slane %v1209_v4, %v8562_v41  ;;  %v1280_v28 = vrot.slane %v1272_v7, %v8569_v54 }
 0x261   : > { %v1264_v5 = vrot.slane %v1256_v9, %v8562_v41  ;;  %v1248_v6 = vrot.slane %v1240_v20, %v8562_v41  ;;  %v1271_v12 = vrot.slane %v1257_v1, %v8562_v41  ;;  %v1255_v13 = vrot.slane %v1241_v2, %v8562_v41 }
 0x262   : > { %v1159_v8 = vpop.permute.xlu1 %1158  ;;  %v1151_v0 = vpop.permute.xlu0 %1150  ;;  %v1288_v1 = vcombine.low %v1223_v40, %v1239_v33 }
 0x263   : > { %v1304_v35 = vcombine.low %v1248_v6, %v1264_v5  ;;  %v1305_v34 = vcombine.high %v1248_v6, %v1264_v5  ;;  %v1320_v43 = vcombine.low %v1255_v13, %v1271_v12  ;;  %v1321_v3 = vcombine.high %v1255_v13, %v1271_v12 }
 0x264   : > { %v1296_v37 = vrot.slane %v1288_v1, %v8569_v54 }
 0x265   : > { %v1312_v36 = vrot.slane %v1304_v35, %v8569_v54  ;;  %v1319_v20 = vrot.slane %v1305_v34, %v8569_v54  ;;  %v1328_v7 = vrot.slane %v1320_v43, %v8569_v54 }
 0x266   : > { %v1175_v38 = vpop.permute.xlu1 %1174  ;;  %v1167_v39 = vpop.permute.xlu0 %1166 }
 0x267   : > { %v8779_v45 = vcombine.high %v1280_v28, %v1312_v36  ;;  %v8781_v9 = vcombine.low %v1280_v28, %v1312_v36  ;;  %v1360_v2 = vcombine.low %v1159_v8, %v1175_v38  ;;  %v1344_v5 = vcombine.low %v1151_v0, %v1167_v39 }
 0x268   : > { %v8787_v4 = vcombine.high %v1287_v44, %v1319_v20  ;;  %v8789_v6 = vcombine.low %v1287_v44, %v1319_v20  ;;  %v1289_v36 = vcombine.high %v1223_v40, %v1239_v33  ;;  %v1335_v20 = vrot.slane %v1321_v3, %v8569_v54 }
 0x269   : > { %2476 = vperm.xlu0 %8125, %v8779_v45   ;;  %2471 = vperm.xlu1 %8126, %v8781_v9   ;;  %v1368_v34 = vrot.slane %v1360_v2, %v8562_v41  ;;  %v1352_v28 = vrot.slane %v1344_v5, %v8562_v41  ;;  %v1341_v43 = vcombine.high %v1296_v37, %v1328_v7 }
 0x26a   : > { %v1191_v35 = vpop.permute.xlu1 %1190  ;;  %v1183_v42 = vpop.permute.xlu0 %1182  ;;  %v1340_v33 = vcombine.low %v1296_v37, %v1328_v7  ;;  %v1361_v40 = vcombine.high %v1159_v8, %v1175_v38  ;;  %v1303_v27 = vrot.slane %v1289_v36, %v8569_v54  ;;  %v1345_v26 = vcombine.high %v1151_v0, %v1167_v39 }
 0x26b   : > { %v1408_v63 = vcombine.low %v1352_v28, %v1368_v34  ;;  %v1409_v3 = vcombine.high %v1352_v28, %v1368_v34 }
 0x26c   : > { %v1343_v23 = vcombine.high %v1303_v27, %v1335_v20  ;;  %v1375_v8 = vrot.slane %v1361_v40, %v8562_v41 }
 0x26d   : > { %2486 = vperm.xlu0 %8125, %v8787_v4   ;;  %2481 = vperm.xlu1 %8126, %v8789_v6   ;;  %v1416_v0 = vrot.slane %v1408_v63, %v8569_v54 }
 0x26e   : > { %v1207_v32 = vpop.permute.xlu1 %1206  ;;  %v1199_v31 = vpop.permute.xlu0 %1198 }
 0x26f   : > { %v1392_v12 = vcombine.low %v1191_v35, %v1207_v32  ;;  %v1376_v13 = vcombine.low %v1183_v42, %v1199_v31  ;;  %v1393_v44 = vcombine.high %v1191_v35, %v1207_v32  ;;  %v1377_v30 = vcombine.high %v1183_v42, %v1199_v31 }
 0x270   : > { %v1342_v35 = vcombine.low %v1303_v27, %v1335_v20  ;;  %v1359_v42 = vrot.slane %v1345_v26, %v8562_v41  ;;  %v1423_v27 = vrot.slane %v1409_v3, %v8569_v54  ;;  %v2572_v3 = vsub.f32 0.0, %v1343_v23 }
 0x271   : > { %v1400_v2 = vrot.slane %v1392_v12, %v8562_v41  ;;  %v1384_v5 = vrot.slane %v1376_v13, %v8562_v41  ;;  %2496 = vperm.xlu0 %8125, %v1341_v43   ;;  %2491 = vperm.xlu1 %8126, %v1340_v33   ;;  %v1407_v22 = vrot.slane %v1393_v44, %v8562_v41 }
 0x272   : > { %v1391_v32 = vrot.slane %v1377_v30, %v8562_v41  ;;  %v1424_v12 = vcombine.low %v1359_v42, %v1375_v8  ;;  %v1425_v34 = vcombine.high %v1359_v42, %v1375_v8  ;;  %v2567_v8 = vsub.f32 0.0, %v8789_v6 }
 0x273   : > { %v1440_v1 = vcombine.low %v1384_v5, %v1400_v2  ;;  %v1441_v31 = vcombine.high %v1384_v5, %v1400_v2  ;;  %v2569_v42 = vsub.f32 0.0, %v1340_v33  ;;  %v8819_v33 = vpop.permute.xlu0 %824 }
 0x274   : > { %v1456_v39 = vcombine.low %v1391_v32, %v1407_v22  ;;  %v1457_v30 = vcombine.high %v1391_v32, %v1407_v22  ;;  %v1432_v63 = vrot.slane %v1424_v12, %v8569_v54  ;;  %v1439_v2 = vrot.slane %v1425_v34, %v8569_v54 }
 0x275   : > { %v1448_v38 = vrot.slane %v1440_v1, %v8569_v54  ;;  %2506 = vperm.xlu0 %8125, %v1343_v23   ;;  %2501 = vperm.xlu1 %8126, %v1342_v35   ;;  %v1455_v37 = vrot.slane %v1441_v31, %v8569_v54  ;;  %v2566_v22 = vsub.f32 0.0, %v8779_v45  ;;  %v2565_v32 = vsub.f32 0.0, %v8781_v9 }
 0x276   : > { %v1464_v26 = vrot.slane %v1456_v39, %v8569_v54  ;;  %v1471_v40 = vrot.slane %v1457_v30, %v8569_v54  ;;  %v2568_v31 = vsub.f32 0.0, %v8787_v4 }
 0x277   : > { %v1473_v7 = vcombine.high %v1416_v0, %v1448_v38  ;;  %v1472_v36 = vcombine.low %v1416_v0, %v1448_v38  ;;  %v1475_v13 = vcombine.high %v1423_v27, %v1455_v37  ;;  %v1474_v20 = vcombine.low %v1423_v27, %v1455_v37 }
 0x278   : > { %v1477_v28 = vcombine.high %v1432_v63, %v1464_v26  ;;  %v1476_v44 = vcombine.low %v1432_v63, %v1464_v26  ;;  %v1479_v5 = vcombine.high %v1439_v2, %v1471_v40  ;;  %v1478_v1 = vcombine.low %v1439_v2, %v1471_v40 }
 0x279   : > { %2516 = vperm.xlu0 %8125, %v1473_v7   ;;  %2511 = vperm.xlu1 %8126, %v1472_v36   ;;  %v2570_v38 = vsub.f32 0.0, %v1341_v43  ;;  %v2571_v0 = vsub.f32 0.0, %v1342_v35  ;;  %v2574_v39 = vsub.f32 0.0, %v1473_v7  ;;  %v2573_v45 = vsub.f32 0.0, %v1472_v36  ;;  %v8817_v43 = vpop.permute.xlu1 %817  ;;  %v8824_v36 = vpop.permute.xlu0 %838 }
 0x27a   : > { %v2576_v9 = vsub.f32 0.0, %v1475_v13  ;;  %v2575_v37 = vsub.f32 0.0, %v1474_v20  ;;  %v2578_v4 = vsub.f32 0.0, %v1477_v28  ;;  %v2577_v6 = vsub.f32 0.0, %v1476_v44 }
 0x27b   : > { %v2579_v23 = vsub.f32 0.0, %v1478_v1  ;;  %v2580_v35 = vsub.f32 0.0, %v1479_v5 }
 0x27d   : > { %2526 = vperm.xlu0 %8125, %v1475_v13   ;;  %2521 = vperm.xlu1 %8126, %v1474_v20   ;;  %v8822_v7 = vpop.permute.xlu1 %831  ;;  %v8831_v27 = vpop.permute.xlu0 %852 }
 0x281   : > { %2536 = vperm.xlu0 %8125, %v1477_v28   ;;  %2531 = vperm.xlu1 %8126, %v1476_v44   ;;  %v8829_v12 = vpop.permute.xlu1 %845  ;;  %v8838_v13 = vpop.permute.xlu0 %866 }
 0x285   : > { %2546 = vperm.xlu0 %8125, %v1479_v5   ;;  %2541 = vperm.xlu1 %8126, %v1478_v1   ;;  %v8836_v30 = vpop.permute.xlu1 %859 }
 0x289   : > { %2588 = vperm.xlu0 %8125, %v2566_v22   ;;  %2583 = vperm.xlu1 %8126, %v2565_v32  }
 0x28d   : > { %2598 = vperm.xlu0 %8125, %v2568_v31   ;;  %2593 = vperm.xlu1 %8126, %v2567_v8  }
 0x291   : > { %2608 = vperm.xlu0 %8125, %v2570_v38   ;;  %2603 = vperm.xlu1 %8126, %v2569_v42  }
 0x295   : > { %2618 = vperm.xlu0 %8125, %v2572_v3   ;;  %2613 = vperm.xlu1 %8126, %v2571_v0  }
 0x299   : > { %2628 = vperm.xlu0 %8125, %v2574_v39   ;;  %2623 = vperm.xlu1 %8126, %v2573_v45   ;;  %v2775_v45 = vmul.f32 %v8689_v21, %v8726_v57 }
 0x29d   : > { %2638 = vperm.xlu0 %8125, %v2576_v9   ;;  %2633 = vperm.xlu1 %8126, %v2575_v37   ;;  %v2776_v9 = vmul.f32 %v8691_v24, %v8726_v57  ;;  %v2777_v37 = vmul.f32 %v8695_v25, %v8726_v57  ;;  %v2780_v24 = vmul.f32 %v8703_v52, %v8726_v57 }
 0x29e   : > { %v2781_v25 = vmul.f32 %v8707_v53, %v8726_v57  ;;  %v2890_v52 = vmul.f32 %v8747_v19, %v8731_v58  ;;  %v2786_v53 = vmul.f32 %v8717_v61, %v8726_v57  ;;  %v10058_v19 = vld [vmem:[#allocation16_spill] sm:$0xff] }
 0x2a1   : > { %2648 = vperm.xlu0 %8125, %v2578_v4   ;;  %2643 = vperm.xlu1 %8126, %v2577_v6   ;;  %v2778_v4 = vmul.f32 %v8697_v50, %v8726_v57  ;;  %v2779_v6 = vmul.f32 %v8701_v51, %v8726_v57  ;;  %v2782_v50 = vmul.f32 %v8709_v55, %v8726_v57 }
 0x2a2   : > { %v2783_v51 = vmul.f32 %v8711_v56, %v8726_v57  ;;  %v2787_v55 = vmul.f32 %v8719_v62, %v8726_v57  ;;  %v10055_v56 = vld [vmem:[#allocation14_spill] sm:$0xff] }
 0x2a5   : > { %870 = vbcast.lane.b32.xlu0 %v8656_v10, 264  ;;  %2653 = vperm.xlu1 %8126, %v2579_v23   ;;  %v2887_v23 = vmul.f32 %v8737_v14, %v8731_v58  ;;  %v2784_v14 = vmul.f32 %v8713_v59, %v8726_v57  ;;  %v10056_v59 = vld [vmem:[#allocation15_spill] sm:$0xff] }
 0x2a9   : > { %2658 = vperm.xlu0 %8125, %v2580_v35   ;;  %863 = vbcast.lane.b32.xlu1 %v8661_v15, 264  ;;  %v2888_v35 = vmul.f32 %v8739_v17, %v8731_v58  ;;  %v2785_v17 = vmul.f32 %v8715_v60, %v8726_v57  ;;  %v10057_v60 = vld [vmem:[#allocation13_spill] sm:$0xff] }
 0x2ad   : > { %470 = vbcast.lane.b32.xlu0 %v8620_v46, 312  ;;  %458 = vbcast.lane.b32.xlu1 %v8625_v47, 312  ;;  %v8843_v46 = vpop.permute.xlu1 %454  ;;  %v8845_v47 = vpop.permute.xlu0 %466 }
 0x2ae   : > { %10043 = vst [vmem:[#allocation24_spill] sm:$0xff] %v8845_v47 }
 0x2b1   : > { %494 = vbcast.lane.b32.xlu0 %v8632_v48, 312  ;;  %482 = vbcast.lane.b32.xlu1 %v8637_v49, 312  ;;  %v8850_v48 = vpop.permute.xlu1 %478  ;;  %v8852_v49 = vpop.permute.xlu0 %490 }
 0x2b5   : > { %518 = vbcast.lane.b32.xlu0 %v8644_v11, 312  ;;  %506 = vbcast.lane.b32.xlu1 %v8649_v16, 312  ;;  %v8857_v11 = vpop.permute.xlu1 %502  ;;  %v8859_v16 = vpop.permute.xlu0 %514 }
 0x2b9   : > { %542 = vbcast.lane.b32.xlu0 %v8656_v10, 312  ;;  %530 = vbcast.lane.b32.xlu1 %v8661_v15, 312  ;;  %v8865_v10 = vpop.permute.xlu1 %526  ;;  %v8867_v15 = vpop.permute.xlu0 %538 }
 0x2bd   : > { %1849 = vrot.lane.b32.xlu0 %v8615_v29, %s8349_s28  ;;  %1851 = vrot.lane.b32.xlu1 %v8615_v29, %s8350_s29  ;;  %v8872_v20 = vpop.permute.xlu1 %821  ;;  %v8874_v26 = vpop.permute.xlu0 %828  ;;  %s8364_s28 = smov 4   ;;  %s8365_s29 = smov 2  }
 0x2be   : > { %10044 = vst [vmem:[#allocation25_spill] sm:$0xff] %v8872_v20  ;;  %10045 = vst [vmem:[#allocation26_spill] sm:$0xff] %v8874_v26  ;;  %v2889_v26 = vmul.f32 %v8745_v18, %v8731_v58  ;;  %v2892_v20 = vmul.f32 %v10056_v59, %v8731_v58  ;;  %v2903_v18 = vadd.f32 %v2887_v23, %v2775_v45  ;;  %v10060_v45 = vld [vmem:[#allocation18_spill] sm:$0xff] }
 0x2c0   : > { %v2905_v59 = vadd.f32 %v2889_v26, %v2777_v37 }
 0x2c1   : > { %1855 = vrot.lane.b32.xlu0 %v8615_v29, %s8351_s10  ;;  %1853 = vrot.lane.b32.xlu1 %v8615_v29, %s8352_s11  ;;  %v8878_v34 = vpop.permute.xlu1 %835  ;;  %v8880_v63 = vpop.permute.xlu0 %842  ;;  %s8366_s10 = smov 6   ;;  %s8367_s11 = smov 10  }
 0x2c2   : > { %10046 = vst [vmem:[#allocation27_spill] sm:$0xff] %v8878_v34  ;;  %10047 = vst [vmem:[#allocation28_spill] sm:$0xff] %v8880_v63  ;;  %v2891_v63 = vmul.f32 %v10055_v56, %v8731_v58  ;;  %v8951_v34 = vmul.f32 %v10057_v60, %v8726_v57  ;;  %v10059_v60 = vld [vmem:[#allocation17_spill] sm:$0xff] }
 0x2c4   : > { %v8963_v23 = vadd.f32 %v2891_v63, %v2779_v6  ;;  %v10063_v6 = vld [vmem:[#allocation21_spill] sm:$0xff] }
 0x2c5   : > { %1859 = vrot.lane.b32.xlu0 %v8615_v29, %s8353_s13  ;;  %1857 = vrot.lane.b32.xlu1 %v8615_v29, %s8354_s15  ;;  %v8883_v28 = vpop.permute.xlu1 %849  ;;  %v8885_v44 = vpop.permute.xlu0 %856  ;;  %s8368_s13 = smov 8   ;;  %s8369_s15 = smov 14  }
 0x2c6   : > { %10048 = vst [vmem:[#allocation29_spill] sm:$0xff] %v8883_v28  ;;  %10049 = vst [vmem:[#allocation30_spill] sm:$0xff] %v8885_v44  ;;  %v2904_v28 = vadd.f32 %v2888_v35, %v2776_v9  ;;  %v2895_v9 = vmul.f32 %v10060_v45, %v8731_v58  ;;  %v2908_v35 = vadd.f32 %v2892_v20, %v2780_v24 }
 0x2c9   : > { %1863 = vrot.lane.b32.xlu0 %v8615_v29, %s8355_s9  ;;  %1861 = vrot.lane.b32.xlu1 %v8615_v29, %s8356_s12  ;;  %s8371_s12 = smov 18  }
 0x2cd   : > { %1867 = vrot.lane.b32.xlu0 %v8615_v29, %s8357_s14  ;;  %1865 = vrot.lane.b32.xlu1 %v8615_v29, %s8358_s16  ;;  %s8372_s14 = smov 16   ;;  %s8373_s16 = smov 22  }
 0x2d1   : > { %1871 = vrot.lane.b32.xlu0 %v8615_v29, %s8359_s17  ;;  %1869 = vrot.lane.b32.xlu1 %v8615_v29, %s8360_s18  ;;  %s8374_s17 = smov 20   ;;  %s8375_s18 = smov 26  }
 0x2d5   : > { %1875 = vrot.lane.b32.xlu0 %v8615_v29, %s8361_s19  ;;  %1873 = vrot.lane.b32.xlu1 %v8615_v29, %s8362_s20  ;;  %s8376_s19 = smov 24   ;;  %s8377_s20 = smov 30  }
 0x2d9   : > { %1877 = vrot.lane.b32.xlu1 %v8615_v29, %s8363_s26  ;;  %s8378_s26 = smov 28  }
 0x2e4   : > { %v2472_v40 = vpop.permute.xlu1 %2471  ;;  %v2477_v2 = vpop.permute.xlu0 %2476 }
 0x2e5   : > { %v2549_v54 = vmul.f32 %v2472_v40, %v8726_v57  ;;  %v2550_v62 = vmul.f32 %v2477_v2, %v8726_v57  ;;  %v10061_v2 = vld [vmem:[#allocation19_spill] sm:$0xff] }
 0x2e8   : > { %v2482_v5 = vpop.permute.xlu1 %2481  ;;  %v2487_v1 = vpop.permute.xlu0 %2486 }
 0x2e9   : > { %v2551_v37 = vmul.f32 %v2482_v5, %v8726_v57  ;;  %v10064_v5 = vld [vmem:[#allocation22_spill] sm:$0xff] }
 0x2ec   : > { %v8887_v22 = vpop.permute.xlu1 %2491  ;;  %v8889_v32 = vpop.permute.xlu0 %2496 }
 0x2f0   : > { %v8891_v31 = vpop.permute.xlu1 %2501  ;;  %v8893_v8 = vpop.permute.xlu0 %2506 }
 0x2f4   : > { %v8895_v38 = vpop.permute.xlu1 %2511  ;;  %v8897_v42 = vpop.permute.xlu0 %2516 }
 0x2f8   : > { %v8899_v29 = vpop.permute.xlu1 %2521  ;;  %v8901_v3 = vpop.permute.xlu0 %2526 }
 0x2f9   : > { %10050 = vst [vmem:[#allocation31_spill] sm:$0xff] %v8899_v29  ;;  %v2894_v29 = vmul.f32 %v10059_v60, %v8731_v58  ;;  %v2552_v60 = vmul.f32 %v2487_v1, %v8726_v57  ;;  %v2899_v1 = vmul.f32 %v10064_v5, %v8731_v58  ;;  %v2557_v5 = vmul.f32 %v8895_v38, %v8726_v57 }
 0x2fc   : > { %v8903_v0 = vpop.permute.xlu1 %2531  ;;  %v8905_v39 = vpop.permute.xlu0 %2536 }
 0x2fd   : > { %10051 = vst [vmem:[#allocation32_spill] sm:$0xff] %v8903_v0  ;;  %10052 = vst [vmem:[#allocation33_spill] sm:$0xff] %v8905_v39  ;;  %v2906_v39 = vadd.f32 %v2890_v52, %v2778_v4 }
 0x300   : > { %v8921_v44 = vpop.permute.xlu1 %2541  ;;  %v8923_v21 = vpop.permute.xlu0 %2546 }
 0x301   : > { %10053 = vst [vmem:[#allocation34_spill] sm:$0xff] %v8921_v44  ;;  %10054 = vst [vmem:[#allocation35_spill] sm:$0xff] %v8923_v21  ;;  %v2893_v21 = vmul.f32 %v10058_v19, %v8731_v58 }
 0x303   : > { %v8965_v40 = vadd.f32 %v2893_v21, %v2781_v25  ;;  %v2898_v21 = vmul.f32 %v10063_v6, %v8731_v58 }
 0x304   : > { %v2584_v44 = vpop.permute.xlu1 %2583  ;;  %v2589_v61 = vpop.permute.xlu0 %2588 }
 0x305   : > { %v2661_v56 = vmul.f32 %v2584_v44, %v8731_v58  ;;  %v2662_v0 = vmul.f32 %v2589_v61, %v8731_v58  ;;  %v2896_v44 = vmul.f32 %v10061_v2, %v8731_v58  ;;  %v10062_v61 = vld [vmem:[#allocation20_spill] sm:$0xff]  ;;  %v9015_v2 = vadd.f32 %v2899_v1, %v2787_v55 }
 0x306   : > { %v2897_v26 = vmul.f32 %v10062_v61, %v8731_v58  ;;  %v873_v61 = vcombine.high %v8817_v43, %v8822_v7 }
 0x307   : > { %v2677_v19 = vadd.f32 %v2661_v56, %v2549_v54  ;;  %v2678_v47 = vadd.f32 %v2662_v0, %v2550_v62  ;;  %v8977_v54 = vadd.f32 %v2894_v29, %v2782_v50  ;;  %v8979_v0 = vadd.f32 %v2895_v9, %v2783_v51 }
 0x308   : > { %v2594_v4 = vpop.permute.xlu1 %2593  ;;  %v2599_v52 = vpop.permute.xlu0 %2598  ;;  %v10065_v62 = vmov 0.0   ;;  %v8992_v29 = vadd.f32 %v2897_v26, %v2785_v17  ;;  %v872_v50 = vcombine.low %v8817_v43, %v8822_v7  ;;  %v888_v51 = vcombine.low %v8819_v33, %v8824_v36  ;;  %v10066_v17 = vld [vmem:[#allocation23_spill] sm:$0xff] }
 0x309   : > { %v2663_v63 = vmul.f32 %v2594_v4, %v8731_v58  ;;  %v2664_v20 = vmul.f32 %v2599_v52, %v8731_v58  ;;  %7770 = vmatmul.mubr.msk.f32.vlgmr.msra.gmra.mxu1 %vm2917_vm3, %v2677_v19  ;;  %7775 = vmatmul.mubr.msk.f32.vlgmr.msra.gmra.mxu0 %vm2917_vm3, %v2678_v47  ;;  %v8990_v47 = vadd.f32 %v2896_v44, %v2784_v14 }
 0x30a   : > { %7778 = vmatpush3.xpose.msk.msra.mxu1 %vm2917_vm3, %v2903_v18  ;;  %7783 = vmatpush3.xpose.msk.msra.mxu0 %vm2917_vm3, %v2904_v28  ;;  %v2554_v18 = vmul.f32 %v8889_v32, %v8726_v57  ;;  %v2900_v45 = vmul.f32 %v10066_v17, %v8731_v58  ;;  %v2553_v9 = vmul.f32 %v8887_v22, %v8726_v57 }
 0x30b   : > { %v2679_v24 = vadd.f32 %v2663_v63, %v2551_v37  ;;  %v2680_v25 = vadd.f32 %v2664_v20, %v2552_v60  ;;  %7779 = vmatprep.mubr.msk.f32.mxu1 %vm8345_vm0, %v10065_v62  ;;  %7787 = vmatprep.subr.mxu1 %v10065_v62  ;;  %v9013_v32 = vadd.f32 %v2898_v21, %v2786_v53 }
 0x30c   : > { %7784 = vmatprep.mubr.msk.f32.mxu0 %vm8345_vm0, %v10065_v62  ;;  %7792 = vmatprep.subr.mxu0 %v10065_v62  ;;  %v2609_v28 = vpop.permute.xlu0 %2608  ;;  %v2604_v56 = vpop.permute.xlu1 %2603  ;;  %v889_v22 = vcombine.high %v8819_v33, %v8824_v36  ;;  %v9028_v53 = vrot.slane %v872_v50, %v8562_v41  ;;  %v9031_v55 = vrot.slane %v888_v51, %v8562_v41 }
 0x30d   : > { %v2666_v14 = vmul.f32 %v2609_v28, %v8731_v58  ;;  %7780 = vmatmul.mubr.msk.f32.vlgmr.msra.gmra.mxu1 %vm2917_vm3, %v2679_v24  ;;  %7785 = vmatmul.mubr.msk.f32.vlgmr.msra.gmra.mxu0 %vm2917_vm3, %v2680_v25  ;;  %v2665_v19 = vmul.f32 %v2604_v56, %v8731_v58  ;;  %v9038_v33 = vadd.f32 %v2900_v45, %v8951_v34 }
 0x30e   : > { %7788 = vmatpush3.xpose.msk.msra.mxu1 %vm2917_vm3, %v2905_v59  ;;  %7793 = vmatpush3.xpose.msk.msra.mxu0 %vm2917_vm3, %v2906_v39  ;;  %v2556_v59 = vmul.f32 %v8893_v8, %v8726_v57  ;;  %v2555_v36 = vmul.f32 %v8891_v31, %v8726_v57  ;;  %v904_v8 = vcombine.low %v8829_v12, %v8836_v30 }
 0x30f   : > { %v2682_v44 = vadd.f32 %v2666_v14, %v2554_v18  ;;  %7789 = vmatprep.mubr.msk.f32.mxu1 %vm8345_vm0, %v10065_v62  ;;  %7797 = vmatprep.subr.mxu1 %v10065_v62  ;;  %v2681_v26 = vadd.f32 %v2665_v19, %v2553_v9  ;;  %v920_v4 = vcombine.low %v8831_v27, %v8838_v13  ;;  %v10067_v18 = vld [vmem:[#allocation24_spill] sm:$0xff]  ;;  %v10068_v14 = vld [vmem:[#allocation31_spill] sm:$0xff] }
 0x310   : > { %7794 = vmatprep.mubr.msk.f32.mxu0 %vm8345_vm0, %v10065_v62  ;;  %7802 = vmatprep.subr.mxu0 %v10065_v62  ;;  %v2619_v39 = vpop.permute.xlu0 %2618  ;;  %v2614_v43 = vpop.permute.xlu1 %2613  ;;  %v9054_v34 = vrot.slane %v873_v61, %v8562_v41  ;;  %v9057_v31 = vrot.slane %v889_v22, %v8562_v41  ;;  %v936_v63 = vcombine.low %v9028_v53, %v9031_v55 }
 0x311   : > { %v2668_v7 = vmul.f32 %v2619_v39, %v8731_v58  ;;  %7795 = vmatmul.mubr.msk.f32.vlgmr.msra.gmra.mxu0 %vm2917_vm3, %v2682_v44  ;;  %v2667_v37 = vmul.f32 %v2614_v43, %v8731_v58  ;;  %7790 = vmatmul.mubr.msk.f32.vlgmr.msra.gmra.mxu1 %vm2917_vm3, %v2681_v26  ;;  %v905_v21 = vcombine.high %v8829_v12, %v8836_v30  ;;  %v10070_v43 = vld [vmem:[#allocation32_spill] sm:$0xff] }
 0x312   : > { %7803 = vmatpush3.xpose.msk.msra.mxu0 %vm2917_vm3, %v2908_v35  ;;  %7798 = vmatpush3.xpose.msk.msra.mxu1 %vm2917_vm3, %v8963_v23  ;;  %v2558_v23 = vmul.f32 %v8897_v42, %v8726_v57  ;;  %v9078_v42 = vrot.slane %v904_v8, %v8562_v41  ;;  %v9081_v24 = vrot.slane %v920_v4, %v8562_v41 }
 0x313   : > { %v2684_v52 = vadd.f32 %v2668_v7, %v2556_v59  ;;  %7799 = vmatprep.mubr.msk.f32.mxu1 %vm8345_vm0, %v10065_v62  ;;  %v2683_v35 = vadd.f32 %v2667_v37, %v2555_v36  ;;  %7807 = vmatprep.subr.mxu1 %v10065_v62  ;;  %v576_v12 = vcombine.low %v8857_v11, %v8865_v10 }
 0x314   : > { %7804 = vmatprep.mubr.msk.f32.mxu0 %vm8345_vm0, %v10065_v62  ;;  %v2629_v60 = vpop.permute.xlu0 %2628  ;;  %v2624_v20 = vpop.permute.xlu1 %2623  ;;  %7812 = vmatprep.subr.mxu0 %v10065_v62  ;;  %v592_v30 = vcombine.low %v8859_v16, %v8867_v15  ;;  %v544_v50 = vcombine.low %v8843_v46, %v8850_v48  ;;  %v560_v56 = vcombine.low %v10067_v18, %v8852_v49 }
 0x315   : > { %v2670_v6 = vmul.f32 %v2629_v60, %v8731_v58  ;;  %7805 = vmatmul.mubr.msk.f32.vlgmr.msra.gmra.mxu0 %vm2917_vm3, %v2684_v52  ;;  %v2669_v1 = vmul.f32 %v2624_v20, %v8731_v58  ;;  %7800 = vmatmul.mubr.msk.f32.vlgmr.msra.gmra.mxu1 %vm2917_vm3, %v2683_v35  ;;  %v2559_v17 = vmul.f32 %v10068_v14, %v8726_v57  ;;  %v10071_v52 = vld [vmem:[#allocation12_spill] sm:$0xff] }
 0x316   : > { %7813 = vmatpush3.xpose.msk.msra.mxu0 %vm2917_vm3, %v8977_v54  ;;  %7808 = vmatpush3.xpose.msk.msra.mxu1 %vm2917_vm3, %v8965_v40  ;;  %v2560_v40 = vmul.f32 %v8901_v3, %v8726_v57  ;;  %v921_v3 = vcombine.high %v8831_v27, %v8838_v13  ;;  %v968_v9 = vcombine.low %v9078_v42, %v9081_v24 }
 0x317   : > { %v2686_v25 = vadd.f32 %v2670_v6, %v2558_v23  ;;  %7809 = vmatprep.mubr.msk.f32.mxu1 %vm8345_vm0, %v10065_v62  ;;  %v2685_v38 = vadd.f32 %v2669_v1, %v2557_v5  ;;  %7817 = vmatprep.subr.mxu1 %v10065_v62  ;;  %v9118_v44 = vrot.slane %v576_v12, %v8562_v41 }
 0x318   : > { %7814 = vmatprep.mubr.msk.f32.mxu0 %vm8345_vm0, %v10065_v62  ;;  %v2639_v54 = vpop.permute.xlu0 %2638  ;;  %v2634_v28 = vpop.permute.xlu1 %2633  ;;  %7822 = vmatprep.subr.mxu0 %v10065_v62  ;;  %v9121_v61 = vrot.slane %v592_v30, %v8562_v41  ;;  %v9127_v13 = vrot.slane %v544_v50, %v8562_v41  ;;  %v9135_v59 = vrot.slane %v560_v56, %v8562_v41 }
 0x319   : > { %v2672_v51 = vmul.f32 %v2639_v54, %v8731_v58  ;;  %7815 = vmatmul.mubr.msk.f32.vlgmr.msra.gmra.mxu0 %vm2917_vm3, %v2686_v25  ;;  %v2671_v45 = vmul.f32 %v2634_v28, %v8731_v58  ;;  %7810 = vmatmul.mubr.msk.f32.vlgmr.msra.gmra.mxu1 %vm2917_vm3, %v2685_v38  ;;  %v2561_v7 = vmul.f32 %v10070_v43, %v8726_v57 }
 0x31a   : > { %7823 = vmatpush3.xpose.msk.msra.mxu0 %vm2917_vm3, %v8990_v47  ;;  %7818 = vmatpush3.xpose.msk.msra.mxu1 %vm2917_vm3, %v8979_v0  ;;  %v10069_v0 = vld [vmem:[#allocation33_spill] sm:$0xff]  ;;  %v937_v37 = vcombine.high %v9028_v53, %v9031_v55  ;;  %v969_v8 = vcombine.high %v9078_v42, %v9081_v24  ;;  %v9152_v35 = vrot.slane %v968_v9, %v10071_v52  ;;  %v10072_v42 = vld [vmem:[#allocation34_spill] sm:$0xff] }
 0x31b   : > { %v2688_v19 = vadd.f32 %v2672_v51, %v2560_v40  ;;  %7819 = vmatprep.mubr.msk.f32.mxu1 %vm8345_vm0, %v10065_v62  ;;  %v2687_v47 = vadd.f32 %v2671_v45, %v2559_v17  ;;  %7827 = vmatprep.subr.mxu1 %v10065_v62  ;;  %v2562_v22 = vmul.f32 %v10069_v0, %v8726_v57  ;;  %v10078_v0 = vld [vmem:[#allocation26_spill] sm:$0xff] }
 0x31c   : > { %7824 = vmatprep.mubr.msk.f32.mxu0 %vm8345_vm0, %v10065_v62  ;;  %v2649_v27 = vpop.permute.xlu0 %2648  ;;  %v2644_v26 = vpop.permute.xlu1 %2643  ;;  %7832 = vmatprep.subr.mxu0 %v10065_v62  ;;  %v640_v60 = vcombine.low %v9118_v44, %v9121_v61  ;;  %v9166_v20 = vrot.slane %v905_v21, %v8562_v41  ;;  %v9169_v6 = vrot.slane %v921_v3, %v8562_v41 }
 0x31d   : > { %v2674_v39 = vmul.f32 %v2649_v27, %v8731_v58  ;;  %7825 = vmatmul.mubr.msk.f32.vlgmr.msra.gmra.mxu0 %vm2917_vm3, %v2688_v19  ;;  %v2673_v36 = vmul.f32 %v2644_v26, %v8731_v58  ;;  %7820 = vmatmul.mubr.msk.f32.vlgmr.msra.gmra.mxu1 %vm2917_vm3, %v2687_v47  ;;  %v608_v1 = vcombine.low %v9127_v13, %v9135_v59  ;;  %v10076_v47 = vld [vmem:[#allocation25_spill] sm:$0xff]  ;;  %v10079_v26 = vld [vmem:[#allocation30_spill] sm:$0xff] }
 0x31e   : > { %7833 = vmatpush3.xpose.msk.msra.mxu0 %vm2917_vm3, %v9013_v32  ;;  %7828 = vmatpush3.xpose.msk.msra.mxu1 %vm2917_vm3, %v8992_v29  ;;  %v944_v29 = vrot.slane %v936_v63, %v10071_v52  ;;  %v2563_v24 = vmul.f32 %v10072_v42, %v8726_v57  ;;  %v9182_v55 = vrot.slane %v969_v8, %v10071_v52 }
 0x31f   : > { %v2690_v4 = vadd.f32 %v2674_v39, %v2562_v22  ;;  %7829 = vmatprep.mubr.msk.f32.mxu1 %vm8345_vm0, %v10065_v62  ;;  %v2689_v32 = vadd.f32 %v2673_v36, %v2561_v7  ;;  %7837 = vmatprep.subr.mxu1 %v10065_v62  ;;  %v577_v63 = vcombine.high %v8857_v11, %v8865_v10  ;;  %v10073_v10 = vld [vmem:[#allocation35_spill] sm:$0xff] }
 0x320   : > { %7834 = vmatprep.mubr.msk.f32.mxu0 %vm8345_vm0, %v10065_v62  ;;  %v9159_v23 = vpop.permute.xlu0 %870  ;;  %v2654_v5 = vpop.permute.xlu1 %2653  ;;  %7842 = vmatprep.subr.mxu0 %v10065_v62  ;;  %v593_v21 = vcombine.high %v8859_v16, %v8867_v15  ;;  %v1000_v25 = vcombine.low %v944_v29, %v9152_v35  ;;  %v9194_v12 = vrot.slane %v640_v60, %v10071_v52 }
 0x321   : > { %7835 = vmatmul.mubr.msk.f32.vlgmr.msra.gmra.mxu0 %vm2917_vm3, %v2690_v4  ;;  %v2675_v53 = vmul.f32 %v2654_v5, %v8731_v58  ;;  %7830 = vmatmul.mubr.msk.f32.vlgmr.msra.gmra.mxu1 %vm2917_vm3, %v2689_v32  ;;  %v545_v11 = vcombine.high %v8843_v46, %v8850_v48  ;;  %v561_v16 = vcombine.high %v10067_v18, %v8852_v49  ;;  %v10074_v18 = vld [vmem:[#allocation29_spill] sm:$0xff] }
 0x322   : > { %7843 = vmatpush3.xpose.msk.msra.mxu0 %vm2917_vm3, %v9038_v33  ;;  %7838 = vmatpush3.xpose.msk.msra.mxu1 %vm2917_vm3, %v9015_v2  ;;  %v2564_v15 = vmul.f32 %v10073_v10, %v8726_v57  ;;  %v9210_v54 = vrot.slane %v937_v37, %v10071_v52  ;;  %v984_v50 = vcombine.low %v9166_v20, %v9169_v6 }
 0x323   : > { %7839 = vmatprep.mubr.msk.f32.mxu1 %vm8345_vm0, %v10065_v62  ;;  %v2691_v33 = vadd.f32 %v2675_v53, %v2563_v24  ;;  %7847 = vmatprep.subr.mxu1 %v10065_v62  ;;  %v616_v46 = vrot.slane %v608_v1, %v10071_v52  ;;  %v641_v48 = vcombine.high %v9118_v44, %v9121_v61  ;;  %v10075_v61 = vld [vmem:[#allocation27_spill] sm:$0xff] }
 0x324   : > { %v2659_v30 = vpop.permute.xlu0 %2658  ;;  %7844 = vmatprep.mubr.msk.f32.mxu0 %vm8345_vm0, %v10065_v62  ;;  %v9205_v2 = vpop.permute.xlu1 %863  ;;  %7852 = vmatprep.subr.mxu0 %v10065_v62  ;;  %v591_v57 = vrot.slane %v577_v63, %v8562_v41  ;;  %v607_v49 = vrot.slane %v593_v21, %v8562_v41  ;;  %v952_v40 = vcombine.low %v9054_v34, %v9057_v31 }
 0x325   : > { %v2676_v38 = vmul.f32 %v2659_v30, %v8731_v58  ;;  %7840 = vmatmul.mubr.msk.f32.vlgmr.msra.gmra.mxu1 %vm2917_vm3, %v2691_v33  ;;  %v609_v28 = vcombine.high %v9127_v13, %v9135_v59  ;;  %v672_v51 = vcombine.low %v616_v46, %v9194_v12  ;;  %v1040_v56 = vcombine.low %v10074_v18, %v9205_v2  ;;  %v10077_v13 = vld [vmem:[#allocation28_spill] sm:$0xff] }
 0x326   : > { %7848 = vmatpush3.xpose.msk.msra.mxu1 %vm4134_vm4, %v1000_v25  ;;  %7849 = vmatprep.mubr.msk.f32.mxu1 %vm8345_vm0, %v10065_v62  ;;  %v1001_v17 = vcombine.high %v944_v29, %v9152_v35  ;;  %v1002_v45 = vcombine.low %v9210_v54, %v9182_v55  ;;  %v559_v3 = vrot.slane %v545_v11, %v8562_v41 }
 0x327   : > { %v2692_v58 = vadd.f32 %v2676_v38, %v2564_v15  ;;  %7857 = vmatprep.subr.mxu1 %v10065_v62  ;;  %v575_v9 = vrot.slane %v561_v16, %v8562_v41  ;;  %v655_v44 = vrot.slane %v641_v48, %v10071_v52  ;;  %v1008_v27 = vcombine.low %v10076_v47, %v10075_v61 }
 0x328   : > { %v9231_v14 = vpop.permute.xlu0 %470  ;;  %v9238_v19 = vpop.permute.xlu1 %458  ;;  %v1024_v22 = vcombine.low %v10078_v0, %v10077_v13  ;;  %v1056_v39 = vcombine.low %v10079_v26, %v9159_v23  ;;  %v985_v59 = vcombine.high %v9166_v20, %v9169_v6  ;;  %v992_v43 = vrot.slane %v984_v50, %v10071_v52 }
 0x329   : > { %7845 = vmatmul.mubr.msk.f32.vlgmr.msra.gmra.mxu0 %vm2917_vm3, %v2692_v58  ;;  %7850 = vmatmul.mubr.msk.f32.vlgmr.msra.gmra.mxu1 %vm4134_vm4, %v672_v51  ;;  %v656_v7 = vcombine.low %v591_v57, %v607_v49  ;;  %v953_v36 = vcombine.high %v9054_v34, %v9057_v31  ;;  %v960_v37 = vrot.slane %v952_v40, %v10071_v52 }
 0x32a   : > { %7853 = vmatpush3.xpose.msk.msra.mxu0 %vm4134_vm4, %v1001_v17  ;;  %7858 = vmatpush3.xpose.msk.msra.mxu1 %vm4134_vm4, %v1002_v45  ;;  %v623_v8 = vrot.slane %v609_v28, %v10071_v52  ;;  %v9259_v4 = vrot.slane %v1040_v56, %v8562_v41  ;;  %v624_v60 = vcombine.low %v559_v3, %v575_v9 }
 0x32b   : > { %7854 = vmatprep.mubr.msk.f32.mxu0 %vm8345_vm0, %v10065_v62  ;;  %v657_v32 = vcombine.high %v591_v57, %v607_v49  ;;  %v673_v29 = vcombine.high %v616_v46, %v9194_v12  ;;  %7859 = vmatprep.mubr.msk.f32.mxu1 %vm8345_vm0, %v10065_v62  ;;  %v9272_v31 = vrot.slane %v1008_v27, %v8562_v41 }
 0x32c   : > { %v9263_v35 = vpop.permute.xlu0 %494  ;;  %v9266_v20 = vpop.permute.xlu1 %482  ;;  %7862 = vmatprep.subr.mxu0 %v10065_v62  ;;  %v674_v34 = vcombine.low %v623_v8, %v655_v44  ;;  %v9275_v6 = vrot.slane %v1024_v22, %v8562_v41  ;;  %v9278_v5 = vrot.slane %v1056_v39, %v8562_v41  ;;  %7867 = vmatprep.subr.mxu1 %v10065_v62 }
 0x32d   : > { %v9282_v1 = vrot.slane %v985_v59, %v10071_v52  ;;  %v1003_v42 = vcombine.high %v9210_v54, %v9182_v55  ;;  %v1004_v24 = vcombine.low %v960_v37, %v992_v43  ;;  %v664_v53 = vrot.slane %v656_v7, %v10071_v52  ;;  %7855 = vmatmul.mubr.msk.f32.vlgmr.msra.gmra.mxu0 %vm4134_vm4, %v673_v29 }
 0x32e   : > { %v967_v63 = vrot.slane %v953_v36, %v10071_v52  ;;  %v1005_v21 = vcombine.high %v960_v37, %v992_v43  ;;  %v625_v25 = vcombine.high %v559_v3, %v575_v9  ;;  %v1104_v12 = vcombine.low %v9259_v4, %v9278_v5  ;;  %7860 = vmatmul.mubr.msk.f32.vlgmr.msra.gmra.mxu1 %vm4134_vm4, %v674_v34 }
 0x32f   : > { %v632_v30 = vrot.slane %v624_v60, %v10071_v52  ;;  %v680_v55 = vcombine.low %v9238_v19, %v9266_v20  ;;  %v696_v11 = vcombine.low %v9231_v14, %v9263_v35  ;;  %7863 = vmatpush3.xpose.msk.msra.mxu0 %vm4134_vm4, %v1003_v42  ;;  %7868 = vmatpush3.xpose.msk.msra.mxu1 %vm4134_vm4, %v1004_v24 }
 0x330   : > { %v9292_v33 = vpop.permute.xlu0 %518  ;;  %v9301_v16 = vpop.permute.xlu1 %506  ;;  %v9304_v10 = vrot.slane %v657_v32, %v10071_v52  ;;  %v675_v15 = vcombine.high %v623_v8, %v655_v44  ;;  %v1072_v38 = vcombine.low %v9272_v31, %v9275_v6  ;;  %7864 = vmatprep.mubr.msk.f32.mxu0 %vm8345_vm0, %v10065_v62  ;;  %7869 = vmatprep.mubr.msk.f32.mxu1 %vm8345_vm0, %v10065_v62 }
 0x331   : > { %v1006_v54 = vcombine.low %v967_v63, %v9282_v1  ;;  %v1007_v50 = vcombine.high %v967_v63, %v9282_v1  ;;  %v676_v46 = vcombine.low %v632_v30, %v664_v53  ;;  %7872 = vmatprep.subr.mxu0 %v10065_v62  ;;  %7877 = vmatprep.subr.mxu1 %v10065_v62 }
 0x332   : > { %v639_v48 = vrot.slane %v625_v25, %v10071_v52  ;;  %v1009_v57 = vcombine.high %v10076_v47, %v10075_v61  ;;  %v1041_v49 = vcombine.high %v10074_v18, %v9205_v2  ;;  %v1112_v58 = vrot.slane %v1104_v12, %v10071_v52  ;;  %7865 = vmatmul.mubr.msk.f32.vlgmr.msra.gmra.mxu0 %vm4134_vm4, %v675_v15 }
 0x333   : > { %v9324_v28 = vrot.slane %v680_v55, %v8562_v41  ;;  %v9327_v51 = vrot.slane %v696_v11, %v8562_v41  ;;  %7870 = vmatmul.mubr.msk.f32.vlgmr.msra.gmra.mxu1 %vm4134_vm4, %v676_v46  ;;  %7873 = vmatpush3.xpose.msk.msra.mxu0 %vm4134_vm4, %v1005_v21  ;;  %v677_v45 = vcombine.high %v632_v30, %v664_v53 }
 0x334   : > { %v543_v40 = vpop.permute.xlu0 %542  ;;  %v531_v56 = vpop.permute.xlu1 %530  ;;  %v678_v2 = vcombine.low %v639_v48, %v9304_v10  ;;  %v1025_v18 = vcombine.high %v10078_v0, %v10077_v13  ;;  %v1080_v3 = vrot.slane %v1072_v38, %v10071_v52  ;;  %7878 = vmatpush3.xpose.msk.msra.mxu1 %vm4134_vm4, %v1006_v54  ;;  %v1057_v9 = vcombine.high %v10079_v26, %v9159_v23 }
 0x335   : > { %v728_v17 = vcombine.low %v9292_v33, %v543_v40  ;;  %v712_v44 = vcombine.low %v9301_v16, %v531_v56  ;;  %7874 = vmatprep.mubr.msk.f32.mxu0 %vm8345_vm0, %v10065_v62  ;;  %7879 = vmatprep.mubr.msk.f32.mxu1 %vm8345_vm0, %v10065_v62  ;;  %v679_v47 = vcombine.high %v639_v48, %v9304_v10 }
 0x336   : > { %v9347_v27 = vrot.slane %v1009_v57, %v8562_v41  ;;  %v1136_v13 = vcombine.low %v1080_v3, %v1112_v58  ;;  %7882 = vmatprep.subr.mxu0 %v10065_v62  ;;  %7887 = vmatprep.subr.mxu1 %v10065_v62  ;;  %v9352_v0 = vrot.slane %v1041_v49, %v8562_v41 }
 0x337   : > { %v736_v61 = vrot.slane %v728_v17, %v8562_v41  ;;  %v744_v22 = vcombine.low %v9324_v28, %v9327_v51  ;;  %v720_v26 = vrot.slane %v712_v44, %v8562_v41  ;;  %7875 = vmatmul.mubr.msk.f32.vlgmr.msra.gmra.mxu0 %vm4134_vm4, %v677_v45  ;;  %7880 = vmatmul.mubr.msk.f32.vlgmr.msra.gmra.mxu1 %vm4134_vm4, %v678_v2 }
 0x338   : > { %v1850_v23 = vpop.permute.xlu0 %1849  ;;  %v1852_v39 = vpop.permute.xlu1 %1851  ;;  %v1105_v59 = vcombine.high %v9259_v4, %v9278_v5  ;;  %v713_v43 = vcombine.high %v9301_v16, %v531_v56  ;;  %v729_v7 = vcombine.high %v9292_v33, %v543_v40  ;;  %7883 = vmatpush3.xpose.msk.msra.mxu0 %vm4134_vm4, %v1007_v50  ;;  %7888 = vmatpush3.xpose.msk.msra.mxu1 %vm4134_vm4, %v1136_v13 }
 0x339   : > { %v9366_v36 = vrot.slane %v1025_v18, %v8562_v41  ;;  %v1073_v37 = vcombine.high %v9272_v31, %v9275_v6  ;;  %v1071_v8 = vrot.slane %v1057_v9, %v8562_v41  ;;  %v776_v60 = vcombine.low %v720_v26, %v736_v61  ;;  %7884 = vmatprep.mubr.msk.f32.mxu0 %vm8345_vm0, %v10065_v62 }
 0x33a   : > { %v1137_v4 = vcombine.high %v1080_v3, %v1112_v58  ;;  %v681_v32 = vcombine.high %v9238_v19, %v9266_v20  ;;  %v697_v29 = vcombine.high %v9231_v14, %v9263_v35  ;;  %7892 = vmatprep.subr.mxu0 %v10065_v62  ;;  %1881 = vrot.lane.b32.xlu0 %v1852_v39, %s8355_s9 }
 0x33b   : > { %v1120_v34 = vcombine.low %v9352_v0, %v1071_v8  ;;  %v752_v31 = vrot.slane %v744_v22, %v10071_v52  ;;  %v777_v6 = vcombine.high %v720_v26, %v736_v61  ;;  %v784_v5 = vrot.slane %v776_v60, %v10071_v52  ;;  %7885 = vmatmul.mubr.msk.f32.vlgmr.msra.gmra.mxu0 %vm4134_vm4, %v679_v47 }
 0x33c   : > { %v1854_v1 = vpop.permute.xlu1 %1853  ;;  %v1856_v42 = vpop.permute.xlu0 %1855  ;;  %v1119_v19 = vrot.slane %v1105_v59, %v10071_v52  ;;  %v727_v20 = vrot.slane %v713_v43, %v8562_v41  ;;  %v743_v14 = vrot.slane %v729_v7, %v8562_v41  ;;  %7893 = vmatpush3.xpose.msk.msra.mxu0 %vm4134_vm4, %v1137_v4  ;;  %1879 = vrot.lane.b32.xlu1 %v1850_v23, %s8355_s9 }
 0x33d   : > { %v1088_v35 = vcombine.low %v9347_v27, %v9366_v36  ;;  %v745_v24 = vcombine.high %v9324_v28, %v9327_v51  ;;  %v808_v53 = vcombine.low %v752_v31, %v784_v5  ;;  %v809_v63 = vcombine.high %v752_v31, %v784_v5  ;;  %7889 = vmatprep.mubr.msk.f32.mxu1 %vm8345_vm0, %v10065_v62 }
 0x33e   : > { %v1087_v21 = vrot.slane %v1073_v37, %v10071_v52  ;;  %v695_v25 = vrot.slane %v681_v32, %v8562_v41  ;;  %v711_v12 = vrot.slane %v697_v29, %v8562_v41  ;;  %1885 = vrot.lane.b32.xlu0 %v1856_v42, %s8355_s9  ;;  %v1128_v33 = vrot.slane %v1120_v34, %v10071_v52 }
 0x33f   : > { %v791_v30 = vrot.slane %v777_v6, %v10071_v52  ;;  %7894 = vmatprep.mubr.msk.f32.mxu0 %vm8345_vm0, %v10065_v62  ;;  %7897 = vmatprep.subr.mxu1 %v10065_v62  ;;  %v792_v10 = vcombine.low %v727_v20, %v743_v14  ;;  %v1096_v15 = vrot.slane %v1088_v35, %v10071_v52 }
 0x340   : > { %v1858_v55 = vpop.permute.xlu1 %1857  ;;  %v1138_v11 = vcombine.low %v1087_v21, %v1119_v19  ;;  %v1139_v16 = vcombine.high %v1087_v21, %v1119_v19  ;;  %1883 = vrot.lane.b32.xlu1 %v1854_v1, %s8355_s9  ;;  %7902 = vmatprep.subr.mxu0 %v10065_v62  ;;  %v1121_v38 = vcombine.high %v9352_v0, %v1071_v8  ;;  %v1860_v49 = vpop.permute.xlu0 %1859 }
 0x341   : > { %v759_v54 = vrot.slane %v745_v24, %v10071_v52  ;;  %7890 = vmatmul.mubr.msk.f32.vlgmr.msra.gmra.mxu1 %vm4134_vm4, %v808_v53  ;;  %7895 = vmatmul.mubr.msk.f32.vlgmr.msra.gmra.mxu0 %vm4134_vm4, %v809_v63  ;;  %v760_v50 = vcombine.low %v695_v25, %v711_v12  ;;  %v1089_v46 = vcombine.high %v9347_v27, %v9366_v36 }
 0x342   : > { %7898 = vmatpush3.xpose.msk.msra.mxu1 %vm4134_vm4, %v1138_v11  ;;  %7903 = vmatpush3.xpose.msk.msra.mxu0 %vm4134_vm4, %v1139_v16  ;;  %v1140_v48 = vcombine.low %v1096_v15, %v1128_v33  ;;  %v793_v40 = vcombine.high %v727_v20, %v743_v14  ;;  %v800_v28 = vrot.slane %v792_v10, %v10071_v52 }
 0x343   : > { %v810_v57 = vcombine.low %v759_v54, %v791_v30  ;;  %7899 = vmatprep.mubr.msk.f32.mxu1 %vm8345_vm0, %v10065_v62  ;;  %7904 = vmatprep.mubr.msk.f32.mxu0 %vm8345_vm0, %v10065_v62  ;;  %v811_v51 = vcombine.high %v759_v54, %v791_v30  ;;  %v1135_v56 = vrot.slane %v1121_v38, %v10071_v52 }
 0x344   : > { %v1862_v58 = vpop.permute.xlu1 %1861  ;;  %1887 = vrot.lane.b32.xlu1 %v1858_v55, %s8355_s9  ;;  %7907 = vmatprep.subr.mxu1 %v10065_v62  ;;  %v1141_v17 = vcombine.high %v1096_v15, %v1128_v33  ;;  %v761_v45 = vcombine.high %v695_v25, %v711_v12  ;;  %v768_v2 = vrot.slane %v760_v50, %v10071_v52  ;;  %v1864_v27 = vpop.permute.xlu0 %1863 }
 0x345   : > { %7912 = vmatprep.subr.mxu0 %v10065_v62  ;;  %7900 = vmatmul.mubr.msk.f32.vlgmr.msra.gmra.mxu1 %vm4134_vm4, %v810_v57  ;;  %v1103_v18 = vrot.slane %v1089_v46, %v10071_v52  ;;  %v807_v3 = vrot.slane %v793_v40, %v10071_v52 }
 0x346   : > { %7905 = vmatmul.mubr.msk.f32.vlgmr.msra.gmra.mxu0 %vm4134_vm4, %v811_v51  ;;  %7908 = vmatpush3.xpose.msk.msra.mxu1 %vm4134_vm4, %v1140_v48  ;;  %v812_v9 = vcombine.low %v768_v2, %v800_v28  ;;  %v813_v47 = vcombine.high %v768_v2, %v800_v28  ;;  %v775_v23 = vrot.slane %v761_v45, %v10071_v52 }
 0x347   : > { %7913 = vmatpush3.xpose.msk.msra.mxu0 %vm4134_vm4, %v1141_v17  ;;  %1891 = vrot.lane.b32.xlu0 %v1862_v58, %s8355_s9  ;;  %v1142_v61 = vcombine.low %v1103_v18, %v1135_v56  ;;  %v1143_v13 = vcombine.high %v1103_v18, %v1135_v56 }
 0x348   : > { %1889 = vrot.lane.b32.xlu1 %v1860_v49, %s8355_s9  ;;  %7909 = vmatprep.mubr.msk.f32.mxu1 %vm8345_vm0, %v10065_v62  ;;  %v1866_v44 = vpop.permute.xlu1 %1865  ;;  %v814_v0 = vcombine.low %v775_v23, %v807_v3  ;;  %v815_v22 = vcombine.high %v775_v23, %v807_v3  ;;  %v1868_v39 = vpop.permute.xlu0 %1867 }
 0x349   : > { %7914 = vmatprep.mubr.msk.f32.mxu0 %vm8345_vm0, %v10065_v62  ;;  %7917 = vmatprep.subr.mxu1 %v10065_v62 }
 0x34a   : > { %7922 = vmatprep.subr.mxu0 %v10065_v62  ;;  %7910 = vmatmul.mubr.msk.f32.vlgmr.msra.gmra.mxu1 %vm4134_vm4, %v812_v9 }
 0x34b   : > { %7915 = vmatmul.mubr.msk.f32.vlgmr.msra.gmra.mxu0 %vm4134_vm4, %v813_v47  ;;  %7918 = vmatpush3.xpose.msk.msra.mxu1 %vm4134_vm4, %v1142_v61 }
 0x34c   : > { %7923 = vmatpush3.xpose.msk.msra.mxu0 %vm4134_vm4, %v1143_v13  ;;  %1895 = vrot.lane.b32.xlu1 %v1866_v44, %s8355_s9  ;;  %v1870_v26 = vpop.permute.xlu1 %1869  ;;  %v9459_v59 = vpop.permute.xlu0 %1871 }
 0x34d   : > { %1893 = vrot.lane.b32.xlu0 %v1864_v27, %s8355_s9  ;;  %7919 = vmatprep.mubr.msk.f32.mxu1 %vm8345_vm0, %v10065_v62 }
 0x34e   : > { %7924 = vmatprep.mubr.msk.f32.mxu0 %vm8345_vm0, %v10065_v62  ;;  %7920 = vmatmul.mubr.msk.f32.vlgmr.msra.gmra.mxu1 %vm4134_vm4, %v814_v0 }
 0x34f   : > { %7925 = vmatmul.mubr.msk.f32.vlgmr.msra.gmra.mxu0 %vm4134_vm4, %v815_v22  ;;  %7927 = vmatprep.subr.mxu1 %v10065_v62 }
 0x350   : > { %1897 = vrot.lane.b32.xlu1 %v1868_v39, %s8355_s9  ;;  %7932 = vmatprep.subr.mxu0 %v10065_v62  ;;  %v9461_v43 = vpop.permute.xlu1 %1873  ;;  %v9463_v7 = vpop.permute.xlu0 %1875 }
 0x351   : > { %1899 = vrot.lane.b32.xlu0 %v1870_v26, %s8355_s9  ;;  %7929 = vmatprep.mubr.msk.f32.mxu1 %vm8345_vm0, %v10065_v62 }
 0x352   : > { %7934 = vmatprep.mubr.msk.f32.mxu0 %vm8345_vm0, %v10065_v62 }
 0x354   : > { %v9465_v36 = vpop.permute.xlu1 %1877 }
 0x3ac   : > { %v1882_v8 = vpop.permute.xlu0 %1881 }
 0x3ad   : > { %v1925_v60 = vcombine.low %v1864_v27, %v1882_v8  ;;  %v1926_v4 = vcombine.high %v1864_v27, %v1882_v8 }
 0x3ae   : > { %v1880_v37 = vpop.permute.xlu1 %1879 }
 0x3af   : > { %v1933_v31 = vrot.slane %v1925_v60, %v8562_v41  ;;  %v1940_v6 = vrot.slane %v1926_v4, %v8562_v41 }
 0x3b0   : > { %v1886_v42 = vpop.permute.xlu0 %1885 }
 0x3b2   : > { %v1884_v32 = vpop.permute.xlu1 %1883 }
 0x3b3   : > { %v1941_v29 = vcombine.low %v1880_v37, %v1884_v32  ;;  %v1942_v34 = vcombine.high %v1880_v37, %v1884_v32 }
 0x3b5   : > { %v1949_v5 = vrot.slane %v1941_v29, %v8562_v41  ;;  %v1956_v1 = vrot.slane %v1942_v34, %v8562_v41 }
 0x3b6   : > { %v1888_v19 = vpop.permute.xlu1 %1887 }
 0x3b7   : > { %v1989_v20 = vcombine.low %v1933_v31, %v1949_v5  ;;  %v1990_v14 = vcombine.high %v1933_v31, %v1949_v5  ;;  %v2005_v35 = vcombine.low %v1940_v6, %v1956_v1  ;;  %v2006_v24 = vcombine.high %v1940_v6, %v1956_v1 }
 0x3b9   : > { %v1997_v53 = vrot.slane %v1989_v20, %v10071_v52  ;;  %v2004_v63 = vrot.slane %v1990_v14, %v10071_v52  ;;  %v2013_v21 = vrot.slane %v2005_v35, %v10071_v52  ;;  %v2020_v25 = vrot.slane %v2006_v24, %v10071_v52  ;;  %v1892_v12 = vpop.permute.xlu0 %1891 }
 0x3ba   : > { %v1890_v33 = vpop.permute.xlu1 %1889  ;;  %v1973_v30 = vcombine.low %v1888_v19, %v1892_v12  ;;  %v1974_v55 = vcombine.high %v1888_v19, %v1892_v12 }
 0x3bb   : > { %v7523_v11 = vcombine.low %v1997_v53, %v2004_v63  ;;  %v7525_v16 = vcombine.high %v1997_v53, %v2004_v63  ;;  %v7527_v10 = vcombine.low %v2013_v21, %v2020_v25  ;;  %v7529_v15 = vcombine.high %v2013_v21, %v2020_v25 }
 0x3bc   : > { %v1957_v38 = vcombine.low %v1886_v42, %v1890_v33  ;;  %v1958_v54 = vcombine.high %v1886_v42, %v1890_v33  ;;  %v1981_v50 = vrot.slane %v1973_v30, %v8562_v41  ;;  %v1988_v46 = vrot.slane %v1974_v55, %v8562_v41 }
 0x3bd   : > { %v2205_v48 = vrot.slane %v7523_v11, %v8562_v41  ;;  %v2221_v57 = vrot.slane %v7525_v16, %v8562_v41  ;;  %v2237_v49 = vrot.slane %v7527_v10, %v8562_v41  ;;  %v2253_v58 = vrot.slane %v7529_v15, %v8562_v41 }
 0x3be   : > { %v1965_v40 = vrot.slane %v1957_v38, %v8562_v41  ;;  %v1972_v28 = vrot.slane %v1958_v54, %v8562_v41  ;;  %v1896_v51 = vpop.permute.xlu1 %1895 }
 0x3bf   : > { %v1894_v56 = vpop.permute.xlu0 %1893  ;;  %v2261_v17 = vcombine.low %v2205_v48, %v2221_v57  ;;  %v2293_v45 = vcombine.low %v2237_v49, %v2253_v58  ;;  %v2262_v2 = vcombine.high %v2205_v48, %v2221_v57  ;;  %v2294_v18 = vcombine.high %v2237_v49, %v2253_v58 }
 0x3c0   : > { %v2021_v3 = vcombine.low %v1965_v40, %v1981_v50  ;;  %v2022_v9 = vcombine.high %v1965_v40, %v1981_v50  ;;  %v2037_v44 = vcombine.low %v1972_v28, %v1988_v46  ;;  %v2038_v61 = vcombine.high %v1972_v28, %v1988_v46 }
 0x3c1   : > { %v2269_v47 = vrot.slane %v2261_v17, %v10071_v52  ;;  %v2301_v27 = vrot.slane %v2293_v45, %v10071_v52  ;;  %v9486_v13 = vrot.slane %v2262_v2, %v10071_v52  ;;  %v9489_v23 = vrot.slane %v2294_v18, %v10071_v52 }
 0x3c2   : > { %v2029_v0 = vrot.slane %v2021_v3, %v10071_v52  ;;  %v2036_v22 = vrot.slane %v2022_v9, %v10071_v52  ;;  %v2045_v26 = vrot.slane %v2037_v44, %v10071_v52  ;;  %v2052_v39 = vrot.slane %v2038_v61, %v10071_v52  ;;  %v1898_v37 = vpop.permute.xlu1 %1897 }
 0x3c3   : > { %v2061_v8 = vcombine.low %v1894_v56, %v1898_v37  ;;  %v2062_v60 = vcombine.high %v1894_v56, %v1898_v37  ;;  %v1900_v4 = vpop.permute.xlu0 %1899  ;;  %v2325_v32 = vcombine.low %v2269_v47, %v2301_v27  ;;  %v2326_v29 = vcombine.high %v2269_v47, %v2301_v27 }
 0x3c4   : > { %v7524_v34 = vcombine.low %v2029_v0, %v2036_v22  ;;  %v7526_v31 = vcombine.high %v2029_v0, %v2036_v22  ;;  %v7528_v6 = vcombine.low %v2045_v26, %v2052_v39  ;;  %v7530_v5 = vcombine.high %v2045_v26, %v2052_v39 }
 0x3c5   : > { %v2069_v1 = vrot.slane %v2061_v8, %v8562_v41  ;;  %v2076_v42 = vrot.slane %v2062_v60, %v8562_v41  ;;  %v2077_v19 = vcombine.low %v1896_v51, %v1900_v4  ;;  %v2078_v20 = vcombine.high %v1896_v51, %v1900_v4  ;;  %7928 = vmatpush3.msra.mxu1 %v2325_v32 }
 0x3c6   : > { %v2212_v14 = vrot.slane %v7524_v34, %v8562_v41  ;;  %v2228_v35 = vrot.slane %v7526_v31, %v8562_v41  ;;  %v2244_v24 = vrot.slane %v7528_v6, %v8562_v41  ;;  %v2260_v53 = vrot.slane %v7530_v5, %v8562_v41  ;;  %7933 = vmatpush3.msra.mxu0 %v2326_v29 }
 0x3c7   : > { %v2085_v63 = vrot.slane %v2077_v19, %v8562_v41  ;;  %v2092_v21 = vrot.slane %v2078_v20, %v8562_v41  ;;  %7937 = vmatprep.subr.mxu1 %v10065_v62  ;;  %v2327_v33 = vcombine.low %v9486_v13, %v9489_v23  ;;  %7942 = vmatprep.subr.mxu0 %v10065_v62 }
 0x3c8   : > { %v2328_v30 = vcombine.high %v9486_v13, %v9489_v23  ;;  %v2277_v55 = vcombine.low %v2212_v14, %v2228_v35  ;;  %v2309_v11 = vcombine.low %v2244_v24, %v2260_v53  ;;  %v2278_v16 = vcombine.high %v2212_v14, %v2228_v35 }
 0x3c9   : > { %v9503_v25 = vpop.f32.mrf.mxu1  ;;  %v9505_v12 = vpop.f32.mrf.mxu0  ;;  %v2125_v10 = vcombine.low %v2069_v1, %v2085_v63  ;;  %v2126_v15 = vcombine.high %v2069_v1, %v2085_v63  ;;  %v2141_v38 = vcombine.low %v2076_v42, %v2092_v21  ;;  %v2142_v54 = vcombine.high %v2076_v42, %v2092_v21 }
 0x3ca   : > { %v9514_v48 = vrot.slane %v2277_v55, %v10071_v52  ;;  %v9517_v57 = vrot.slane %v2309_v11, %v10071_v52  ;;  %v9520_v49 = vrot.slane %v2278_v16, %v10071_v52  ;;  %v2310_v58 = vcombine.high %v2244_v24, %v2260_v53 }
 0x3cb   : > { %v7771_v50 = vpop.f32.mrf.mxu1  ;;  %v7776_v46 = vpop.f32.mrf.mxu0  ;;  %v2133_v40 = vrot.slane %v2125_v10, %v10071_v52  ;;  %v2140_v28 = vrot.slane %v2126_v15, %v10071_v52  ;;  %v2149_v51 = vrot.slane %v2141_v38, %v10071_v52  ;;  %v2156_v56 = vrot.slane %v2142_v54, %v10071_v52 }
 0x3cc   : > { %v2329_v2 = vcombine.low %v9514_v48, %v9517_v57  ;;  %v2330_v18 = vcombine.high %v9514_v48, %v9517_v57  ;;  %v9535_v3 = vrot.slane %v2310_v58, %v10071_v52 }
 0x3cd   : > { %v9526_v17 = vpop.f32.mrf.mxu1  ;;  %v9528_v45 = vpop.f32.mrf.mxu0  ;;  %v7531_v9 = vcombine.low %v2133_v40, %v2140_v28  ;;  %v7533_v44 = vcombine.high %v2133_v40, %v2140_v28  ;;  %v7535_v61 = vcombine.low %v2149_v51, %v2156_v56  ;;  %v7537_v47 = vcombine.high %v2149_v51, %v2156_v56 }
 0x3ce   : > { %v2331_v22 = vcombine.low %v9520_v49, %v9535_v3  ;;  %v2332_v26 = vcombine.high %v9520_v49, %v9535_v3 }
 0x3cf   : > { %v7781_v27 = vpop.f32.mrf.mxu1  ;;  %v7786_v0 = vpop.f32.mrf.mxu0  ;;  %v2341_v39 = vrot.slane %v7531_v9, %v8562_v41  ;;  %v2357_v37 = vrot.slane %v7533_v44, %v8562_v41  ;;  %v2373_v8 = vrot.slane %v7535_v61, %v8562_v41  ;;  %v2389_v60 = vrot.slane %v7537_v47, %v8562_v41 }
 0x3d1   : > { %v9545_v4 = vpop.f32.mrf.mxu0  ;;  %v3294_v32 = vpop.f32.mrf.mxu1  ;;  %v2397_v34 = vcombine.low %v2341_v39, %v2357_v37  ;;  %v2429_v31 = vcombine.low %v2373_v8, %v2389_v60  ;;  %v2398_v6 = vcombine.high %v2341_v39, %v2357_v37  ;;  %v2430_v5 = vcombine.high %v2373_v8, %v2389_v60 }
 0x3d3   : > { %v7796_v29 = vpop.f32.mrf.mxu0  ;;  %v7791_v1 = vpop.f32.mrf.mxu1  ;;  %v9550_v19 = vrot.slane %v2397_v34, %v10071_v52  ;;  %v9553_v20 = vrot.slane %v2429_v31, %v10071_v52  ;;  %v9556_v14 = vrot.slane %v2398_v6, %v10071_v52  ;;  %v9559_v35 = vrot.slane %v2430_v5, %v10071_v52 }
 0x3d5   : > { %v9547_v42 = vpop.f32.mrf.mxu0  ;;  %v3446_v24 = vpop.f32.mrf.mxu1  ;;  %v2461_v63 = vcombine.low %v9550_v19, %v9553_v20  ;;  %v2462_v21 = vcombine.high %v9550_v19, %v9553_v20  ;;  %v2463_v55 = vcombine.low %v9556_v14, %v9559_v35  ;;  %v2464_v11 = vcombine.high %v9556_v14, %v9559_v35 }
 0x3d7   : > { %v7806_v53 = vpop.f32.mrf.mxu0  ;;  %v7801_v16 = vpop.f32.mrf.mxu1 }
 0x3d9   : > { %v3674_v10 = vpop.f32.mrf.mxu0  ;;  %v3598_v15 = vpop.f32.mrf.mxu1 }
 0x3db   : > { %v7816_v38 = vpop.f32.mrf.mxu0  ;;  %v7811_v54 = vpop.f32.mrf.mxu1 }
 0x3dd   : > { %v9569_v50 = vpop.f32.mrf.mxu0  ;;  %v9571_v46 = vpop.f32.mrf.mxu1 }
 0x3df   : > { %v7826_v58 = vpop.f32.mrf.mxu0  ;;  %v7821_v40 = vpop.f32.mrf.mxu1 }
 0x3e1   : > { %v9573_v28 = vpop.f32.mrf.mxu0  ;;  %v9575_v51 = vpop.f32.mrf.mxu1 }
 0x3e3   : > { %v7836_v56 = vpop.f32.mrf.mxu0  ;;  %v7831_v9 = vpop.f32.mrf.mxu1 }
 0x3e5   : > { %v9577_v44 = vpop.f32.mrf.mxu1 }
 0x3e7   : > { %v7841_v61 = vpop.f32.mrf.mxu1 }
 0x3e9   : > { %v9579_v47 = vpop.f32.mrf.mxu0  ;;  %v4207_v27 = vpop.f32.mrf.mxu1 }
 0x3ea   : > { %v9582_v0 = vadd.f32 %v4207_v27, %v9503_v25 }
 0x3eb   : > { %v7846_v39 = vpop.f32.mrf.mxu0  ;;  %v7851_v37 = vpop.f32.mrf.mxu1 }
 0x3ec   : > { %v5352_v8 = vsel %vm5351_vm5, %v9582_v0, -inf }
 0x3ed   : > { %5353 = vmax.xlane.f32.xlu1 %v5352_v8  ;;  %v4283_v60 = vpop.f32.mrf.mxu0 }
 0x3ee   : > { %v9587_v29 = vadd.f32 %v4283_v60, %v9505_v12  ;;  %v4359_v34 = vpop.f32.mrf.mxu1 }
 0x3ef   : > { %v7856_v31 = vpop.f32.mrf.mxu0  ;;  %v9590_v6 = vadd.f32 %v4359_v34, %v9526_v17 }
 0x3f0   : > { %v7861_v5 = vpop.f32.mrf.mxu1  ;;  %v5355_v25 = vsel %vm5351_vm5, %v9587_v29, -inf }
 0x3f1   : > { %5356 = vmax.xlane.f32.xlu0 %v5355_v25  ;;  %v5358_v12 = vsel %vm5351_vm5, %v9590_v6, -inf }
 0x3f2   : > { %v4435_v1 = vpop.f32.mrf.mxu0 }
 0x3f3   : > { %v4511_v53 = vpop.f32.mrf.mxu1  ;;  %v9595_v16 = vadd.f32 %v4435_v1, %v9528_v45 }
 0x3f4   : > { %v9597_v38 = vadd.f32 %v4511_v53, %v3294_v32  ;;  %v7866_v54 = vpop.f32.mrf.mxu0 }
 0x3f5   : > { %v7871_v58 = vpop.f32.mrf.mxu1  ;;  %5359 = vmax.xlane.f32.xlu0 %v5358_v12  ;;  %v5361_v17 = vsel %vm5351_vm5, %v9595_v16, -inf }
 0x3f6   : > { %5362 = vmax.xlane.f32.xlu1 %v5361_v17  ;;  %v5364_v45 = vsel %vm5351_vm5, %v9597_v38, -inf }
 0x3f7   : > { %v4663_v40 = vpop.f32.mrf.mxu1  ;;  %v4587_v56 = vpop.f32.mrf.mxu0 }
 0x3f8   : > { %v9603_v9 = vadd.f32 %v4663_v40, %v3446_v24  ;;  %v9606_v61 = vadd.f32 %v4587_v56, %v9545_v4 }
 0x3f9   : > { %v7876_v32 = vpop.f32.mrf.mxu0  ;;  %v7881_v27 = vpop.f32.mrf.mxu1  ;;  %5365 = vmax.xlane.f32.xlu0 %v5364_v45 }
 0x3fa   : > { %v5367_v39 = vsel %vm5351_vm5, %v9606_v61, -inf  ;;  %v5370_v24 = vsel %vm5351_vm5, %v9603_v9, -inf }
 0x3fb   : > { %5368 = vmax.xlane.f32.xlu1 %v5367_v39  ;;  %v4739_v37 = vpop.f32.mrf.mxu0 }
 0x3fc   : > { %v9613_v8 = vadd.f32 %v4739_v37, %v9547_v42 }
 0x3fd   : > { %v7886_v60 = vpop.f32.mrf.mxu0  ;;  %5371 = vmax.xlane.f32.xlu0 %v5370_v24 }
 0x3fe   : > { %v5373_v4 = vsel %vm5351_vm5, %v9613_v8, -inf }
 0x3ff   : > { %5374 = vmax.xlane.f32.xlu1 %v5373_v4 }
 0x401   : > { %v4815_v34 = vpop.f32.mrf.mxu1  ;;  %v4891_v31 = vpop.f32.mrf.mxu0 }
 0x402   : > { %v9619_v5 = vadd.f32 %v4815_v34, %v3598_v15  ;;  %v9621_v25 = vadd.f32 %v4891_v31, %v3674_v10 }
 0x403   : > { %v7891_v1 = vpop.f32.mrf.mxu1  ;;  %v7896_v53 = vpop.f32.mrf.mxu0 }
 0x404   : > { %v5376_v42 = vsel %vm5351_vm5, %v9619_v5, -inf  ;;  %v5379_v54 = vsel %vm5351_vm5, %v9621_v25, -inf }
 0x405   : > { %v4967_v12 = vpop.f32.mrf.mxu1  ;;  %5377 = vmax.xlane.f32.xlu0 %v5376_v42  ;;  %5380 = vmax.xlane.f32.xlu1 %v5379_v54 }
 0x406   : > { %v9628_v58 = vadd.f32 %v4967_v12, %v9571_v46  ;;  %v5043_v17 = vpop.f32.mrf.mxu0 }
 0x407   : > { %v9631_v15 = vadd.f32 %v5043_v17, %v9569_v50  ;;  %v7901_v10 = vpop.f32.mrf.mxu1 }
 0x408   : > { %v7906_v40 = vpop.f32.mrf.mxu0  ;;  %v5382_v56 = vsel %vm5351_vm5, %v9628_v58, -inf }
 0x409   : > { %5383 = vmax.xlane.f32.xlu0 %v5382_v56  ;;  %v5385_v45 = vsel %vm5351_vm5, %v9631_v15, -inf }
 0x40a   : > { %v5119_v32 = vpop.f32.mrf.mxu1  ;;  %5386 = vmax.xlane.f32.xlu1 %v5385_v45 }
 0x40b   : > { %v9638_v27 = vadd.f32 %v5119_v32, %v9575_v51  ;;  %v5195_v46 = vpop.f32.mrf.mxu0 }
 0x40c   : > { %v9641_v39 = vadd.f32 %v5195_v46, %v9573_v28  ;;  %v7911_v50 = vpop.f32.mrf.mxu1 }
 0x40d   : > { %v7916_v37 = vpop.f32.mrf.mxu0  ;;  %v5388_v24 = vsel %vm5351_vm5, %v9638_v27, -inf }
 0x40e   : > { %v5271_v60 = vpop.f32.mrf.mxu1  ;;  %5389 = vmax.xlane.f32.xlu0 %v5388_v24  ;;  %v5391_v4 = vsel %vm5351_vm5, %v9641_v39, -inf }
 0x40f   : > { %v9648_v34 = vadd.f32 %v5271_v60, %v9577_v44  ;;  %5392 = vmax.xlane.f32.xlu1 %v5391_v4  ;;  %v5347_v51 = vpop.f32.mrf.mxu0 }
 0x410   : > { %v9651_v31 = vadd.f32 %v5347_v51, %v9579_v47  ;;  %v7921_v28 = vpop.f32.mrf.mxu1 }
 0x411   : > { %v7926_v1 = vpop.f32.mrf.mxu0  ;;  %v5394_v53 = vsel %vm5351_vm5, %v9648_v34, -inf }
 0x412   : > { %5395 = vmax.xlane.f32.xlu0 %v5394_v53  ;;  %v5397_v42 = vsel %vm5351_vm5, %v9651_v31, -inf }
 0x413   : > { %5398 = vmax.xlane.f32.xlu1 %v5397_v42 }
 0x424   : > { %1903 = vrot.lane.b32.xlu1 %v9461_v43, %s8355_s9 }
 0x428   : > { %1901 = vrot.lane.b32.xlu0 %v9459_v59, %s8355_s9 }
 0x476   : > { %v5354_v44 = vpop.xlane.xlu1 %5353 }
 0x477   : > { %v5400_v47 = vsub.f32 %v9582_v0, %v5354_v44 }
 0x479   : > { %v5416_v54 = vmul.f32 1.442695, %v5400_v47 }
 0x47a   : > { %v5357_v12 = vpop.xlane.xlu0 %5356 }
 0x47b   : > { %8127 = vpow2.f32 %v5416_v54  ;;  %v5401_v17 = vsub.f32 %v9587_v29, %v5357_v12 }
 0x47d   : > { %v5418_v10 = vmul.f32 1.442695, %v5401_v17 }
 0x47e   : > { %v5360_v40 = vpop.xlane.xlu0 %5359 }
 0x47f   : > { %8129 = vpow2.f32 %v5418_v10  ;;  %v5402_v56 = vsub.f32 %v9590_v6, %v5360_v40  ;;  %v5363_v45 = vpop.xlane.xlu1 %5362 }
 0x480   : > { %v5403_v32 = vsub.f32 %v9595_v16, %v5363_v45 }
 0x481   : > { %v5420_v43 = vmul.f32 1.442695, %v5402_v56 }
 0x482   : > { %v5422_v46 = vmul.f32 1.442695, %v5403_v32  ;;  %v5366_v50 = vpop.xlane.xlu0 %5365 }
 0x483   : > { %8131 = vpow2.f32 %v5420_v43  ;;  %v5404_v59 = vsub.f32 %v9597_v38, %v5366_v50 }
 0x484   : > { %v5369_v0 = vpop.xlane.xlu1 %5368  ;;  %8133 = vpow2.f32 %v5422_v46 }
 0x485   : > { %v5424_v37 = vmul.f32 1.442695, %v5404_v59  ;;  %v5405_v24 = vsub.f32 %v9606_v61, %v5369_v0 }
 0x486   : > { %v5372_v29 = vpop.xlane.xlu0 %5371 }
 0x487   : > { %8135 = vpow2.f32 %v5424_v37  ;;  %v5426_v4 = vmul.f32 1.442695, %v5405_v24  ;;  %v5406_v6 = vsub.f32 %v9603_v9, %v5372_v29 }
 0x488   : > { %v9667_v60 = vpop.eup %8127  ;;  %v5375_v51 = vpop.xlane.xlu1 %5374 }
 0x489   : > { %v5448_v16 = vsel %vm5351_vm5, %v9667_v60, 0.0  ;;  %8137 = vpow2.f32 %v5426_v4  ;;  %v5428_v28 = vmul.f32 1.442695, %v5406_v6  ;;  %v5407_v38 = vsub.f32 %v9613_v8, %v5375_v51 }
 0x48a   : > { %5449 = vadd.xlane.f32.xlu0 %v5448_v16 }
 0x48b   : > { %8139 = vpow2.f32 %v5428_v28  ;;  %v5430_v1 = vmul.f32 1.442695, %v5407_v38 }
 0x48c   : > { %v9673_v53 = vpop.eup %8129 }
 0x48d   : > { %8141 = vpow2.f32 %v5430_v1  ;;  %v5451_v61 = vsel %vm5351_vm5, %v9673_v53, 0.0 }
 0x48e   : > { %v5378_v42 = vpop.xlane.xlu0 %5377  ;;  %v5381_v44 = vpop.xlane.xlu1 %5380  ;;  %5452 = vadd.xlane.f32.xlu1 %v5451_v61 }
 0x48f   : > { %v5408_v9 = vsub.f32 %v9619_v5, %v5378_v42  ;;  %v5409_v47 = vsub.f32 %v9621_v25, %v5381_v44 }
 0x490   : > { %v9679_v54 = vpop.eup %8131 }
 0x491   : > { %v5432_v12 = vmul.f32 1.442695, %v5408_v9  ;;  %v5434_v8 = vmul.f32 1.442695, %v5409_v47  ;;  %v5454_v17 = vsel %vm5351_vm5, %v9679_v54, 0.0  ;;  %v9683_v10 = vpop.eup %8133 }
 0x492   : > { %v5384_v40 = vpop.xlane.xlu0 %5383  ;;  %5455 = vadd.xlane.f32.xlu0 %v5454_v17  ;;  %v5457_v43 = vsel %vm5351_vm5, %v9683_v10, 0.0 }
 0x493   : > { %8143 = vpow2.f32 %v5432_v12  ;;  %v5410_v56 = vsub.f32 %v9628_v58, %v5384_v40  ;;  %v5387_v45 = vpop.xlane.xlu1 %5386 }
 0x494   : > { %v9686_v32 = vpop.eup %8135  ;;  %8145 = vpow2.f32 %v5434_v8  ;;  %v5411_v5 = vsub.f32 %v9631_v15, %v5387_v45 }
 0x495   : > { %v5436_v25 = vmul.f32 1.442695, %v5410_v56  ;;  %v5460_v46 = vsel %vm5351_vm5, %v9686_v32, 0.0 }
 0x496   : > { %v9693_v50 = vpop.eup %8137  ;;  %v5438_v59 = vmul.f32 1.442695, %v5411_v5  ;;  %5458 = vadd.xlane.f32.xlu0 %v5457_v43  ;;  %5461 = vadd.xlane.f32.xlu1 %v5460_v46 }
 0x497   : > { %8147 = vpow2.f32 %v5436_v25  ;;  %v5390_v58 = vpop.xlane.xlu0 %5389  ;;  %v5463_v29 = vsel %vm5351_vm5, %v9693_v50, 0.0 }
 0x498   : > { %v9695_v0 = vpop.eup %8139  ;;  %8149 = vpow2.f32 %v5438_v59  ;;  %v5412_v37 = vsub.f32 %v9638_v27, %v5390_v58  ;;  %v5393_v15 = vpop.xlane.xlu1 %5392 }
 0x499   : > { %v5413_v24 = vsub.f32 %v9641_v39, %v5393_v15  ;;  %v5466_v4 = vsel %vm5351_vm5, %v9695_v0, 0.0 }
 0x49a   : > { %v9703_v6 = vpop.eup %8141  ;;  %v5440_v51 = vmul.f32 1.442695, %v5412_v37  ;;  %5464 = vadd.xlane.f32.xlu0 %v5463_v29  ;;  %5467 = vadd.xlane.f32.xlu1 %v5466_v4 }
 0x49b   : > { %v5442_v16 = vmul.f32 1.442695, %v5413_v24  ;;  %v5396_v28 = vpop.xlane.xlu0 %5395  ;;  %v5469_v1 = vsel %vm5351_vm5, %v9703_v6, 0.0 }
 0x49c   : > { %8151 = vpow2.f32 %v5440_v51  ;;  %v5414_v38 = vsub.f32 %v9648_v34, %v5396_v28  ;;  %v5399_v27 = vpop.xlane.xlu1 %5398 }
 0x49d   : > { %8153 = vpow2.f32 %v5442_v16  ;;  %v5415_v39 = vsub.f32 %v9651_v31, %v5399_v27 }
 0x49e   : > { %v5444_v61 = vmul.f32 1.442695, %v5414_v38  ;;  %5470 = vadd.xlane.f32.xlu0 %v5469_v1 }
 0x49f   : > { %v5446_v42 = vmul.f32 1.442695, %v5415_v39  ;;  %v9745_v58 = vpop.permute.xlu0 %1901 }
 0x4a0   : > { %v9709_v44 = vpop.eup %8143  ;;  %8155 = vpow2.f32 %v5444_v61  ;;  %v9747_v15 = vpop.permute.xlu1 %1903 }
 0x4a1   : > { %v9711_v9 = vpop.eup %8145  ;;  %8157 = vpow2.f32 %v5446_v42  ;;  %v5472_v47 = vsel %vm5351_vm5, %v9709_v44, 0.0 }
 0x4a2   : > { %v5475_v34 = vsel %vm5351_vm5, %v9711_v9, 0.0  ;;  %5473 = vadd.xlane.f32.xlu0 %v5472_v47 }
 0x4a3   : > { %5476 = vadd.xlane.f32.xlu1 %v5475_v34 }
 0x4a4   : > { %v9717_v31 = vpop.eup %8147 }
 0x4a5   : > { %v9719_v12 = vpop.eup %8149  ;;  %v5478_v8 = vsel %vm5351_vm5, %v9717_v31, 0.0 }
 0x4a6   : > { %v5481_v17 = vsel %vm5351_vm5, %v9719_v12, 0.0 }
 0x4a7   : > { %5479 = vadd.xlane.f32.xlu1 %v5478_v8  ;;  %5482 = vadd.xlane.f32.xlu0 %v5481_v17 }
 0x4a9   : > { %v9725_v40 = vpop.eup %8151 }
 0x4aa   : > { %v9727_v56 = vpop.eup %8153  ;;  %v5484_v45 = vsel %vm5351_vm5, %v9725_v40, 0.0 }
 0x4ab   : > { %v5487_v5 = vsel %vm5351_vm5, %v9727_v56, 0.0  ;;  %5485 = vadd.xlane.f32.xlu0 %v5484_v45 }
 0x4ac   : > { %5488 = vadd.xlane.f32.xlu1 %v5487_v5 }
 0x4ad   : > { %v9733_v25 = vpop.eup %8155 }
 0x4ae   : > { %v9735_v43 = vpop.eup %8157  ;;  %v5490_v46 = vsel %vm5351_vm5, %v9733_v25, 0.0 }
 0x4af   : > { %v5493_v59 = vsel %vm5351_vm5, %v9735_v43, 0.0 }
 0x4b0   : > { %5491 = vadd.xlane.f32.xlu1 %v5490_v46  ;;  %5494 = vadd.xlane.f32.xlu0 %v5493_v59 }
 0x4c1   : > { %1905 = vrot.lane.b32.xlu1 %v9463_v7, %s8355_s9 }
 0x4c6   : > { %1907 = vrot.lane.b32.xlu0 %v9465_v36, %s8355_s9  ;;  %s8370_s9 = smov 12  }
 0x513   : > { %v5450_v37 = vpop.xlane.xlu0 %5449 }
 0x514   : > { %8159 = vrcp.f32 %v5450_v37 }
 0x517   : > { %v5453_v24 = vpop.xlane.xlu1 %5452 }
 0x518   : > { %8161 = vrcp.f32 %v5453_v24 }
 0x51b   : > { %v5456_v29 = vpop.xlane.xlu0 %5455 }
 0x51c   : > { %8163 = vrcp.f32 %v5456_v29 }
 0x51f   : > { %v5459_v4 = vpop.xlane.xlu0 %5458  ;;  %v5462_v51 = vpop.xlane.xlu1 %5461 }
 0x520   : > { %8165 = vrcp.f32 %v5459_v4 }
 0x521   : > { %v8160_v16 = vpop.eup %8159  ;;  %8167 = vrcp.f32 %v5462_v51 }
 0x522   : > { %v5512_v7 = vmul.f32 %v8160_v16, %v9667_v60 }
 0x523   : > { %v5465_v28 = vpop.xlane.xlu0 %5464  ;;  %v5468_v38 = vpop.xlane.xlu1 %5467 }
 0x524   : > { %7930 = vmatmul.mubr.msk.f32.vlgmr.msra.gmra.mxu1 %vm5351_vm5, %v5512_v7  ;;  %8169 = vrcp.f32 %v5465_v28 }
 0x525   : > { %7938 = vmatpush3.msra.mxu1 %v2327_v33  ;;  %7939 = vmatprep.mubr.msk.f32.mxu1 %vm8345_vm0, %v10065_v62  ;;  %v8162_v36 = vpop.eup %8161  ;;  %8171 = vrcp.f32 %v5468_v38 }
 0x526   : > { %7947 = vmatprep.subr.mxu1 %v10065_v62  ;;  %v5513_v27 = vmul.f32 %v8162_v36, %v9673_v53 }
 0x527   : > { %v5471_v39 = vpop.xlane.xlu0 %5470 }
 0x528   : > { %8173 = vrcp.f32 %v5471_v39  ;;  %7935 = vmatmul.mubr.msk.f32.vlgmr.msra.gmra.mxu0 %vm5351_vm5, %v5513_v27 }
 0x529   : > { %v8164_v60 = vpop.eup %8163  ;;  %7943 = vmatpush3.msra.mxu0 %v2328_v30  ;;  %7944 = vmatprep.mubr.msk.f32.mxu0 %vm8345_vm0, %v10065_v62 }
 0x52a   : > { %v5514_v33 = vmul.f32 %v8164_v60, %v9679_v54  ;;  %7952 = vmatprep.subr.mxu0 %v10065_v62 }
 0x52b   : > { %v5474_v1 = vpop.xlane.xlu0 %5473 }
 0x52c   : > { %v5477_v61 = vpop.xlane.xlu1 %5476  ;;  %8175 = vrcp.f32 %v5474_v1  ;;  %7940 = vmatmul.mubr.msk.f32.vlgmr.msra.gmra.mxu1 %vm5351_vm5, %v5514_v33 }
 0x52d   : > { %v8166_v53 = vpop.eup %8165  ;;  %8177 = vrcp.f32 %v5477_v61  ;;  %7948 = vmatpush3.msra.mxu1 %v2329_v2  ;;  %7949 = vmatprep.mubr.msk.f32.mxu1 %vm8345_vm0, %v10065_v62 }
 0x52e   : > { %v8168_v13 = vpop.eup %8167  ;;  %7957 = vmatprep.subr.mxu1 %v10065_v62  ;;  %v5515_v23 = vmul.f32 %v8166_v53, %v9683_v10 }
 0x52f   : > { %v5516_v30 = vmul.f32 %v8168_v13, %v9686_v32 }
 0x530   : > { %v5480_v54 = vpop.xlane.xlu1 %5479  ;;  %v5483_v42 = vpop.xlane.xlu0 %5482  ;;  %7945 = vmatmul.mubr.msk.f32.vlgmr.msra.gmra.mxu0 %vm5351_vm5, %v5515_v23 }
 0x531   : > { %v8170_v47 = vpop.eup %8169  ;;  %8179 = vrcp.f32 %v5480_v54  ;;  %7950 = vmatmul.mubr.msk.f32.vlgmr.msra.gmra.mxu1 %vm5351_vm5, %v5516_v30  ;;  %7953 = vmatpush3.msra.mxu0 %v2330_v18 }
 0x532   : > { %v8172_v2 = vpop.eup %8171  ;;  %8181 = vrcp.f32 %v5483_v42  ;;  %7958 = vmatpush3.msra.mxu1 %v2331_v22  ;;  %7954 = vmatprep.mubr.msk.f32.mxu0 %vm8345_vm0, %v10065_v62  ;;  %v5517_v10 = vmul.f32 %v8170_v47, %v9693_v50 }
 0x533   : > { %7959 = vmatprep.mubr.msk.f32.mxu1 %vm8345_vm0, %v10065_v62  ;;  %7962 = vmatprep.subr.mxu0 %v10065_v62  ;;  %v5518_v32 = vmul.f32 %v8172_v2, %v9695_v0 }
 0x534   : > { %v5486_v48 = vpop.xlane.xlu0 %5485  ;;  %7967 = vmatprep.subr.mxu1 %v10065_v62  ;;  %7955 = vmatmul.mubr.msk.f32.vlgmr.msra.gmra.mxu0 %vm5351_vm5, %v5517_v10 }
 0x535   : > { %v8174_v57 = vpop.eup %8173  ;;  %v5489_v18 = vpop.xlane.xlu1 %5488  ;;  %7960 = vmatmul.mubr.msk.f32.vlgmr.msra.gmra.mxu1 %vm5351_vm5, %v5518_v32  ;;  %7963 = vmatpush3.msra.mxu0 %v2332_v26  ;;  %8183 = vrcp.f32 %v5486_v48 }
 0x536   : > { %7968 = vmatpush3.msra.mxu1 %v2461_v63  ;;  %7964 = vmatprep.mubr.msk.f32.mxu0 %vm8345_vm0, %v10065_v62  ;;  %v5519_v22 = vmul.f32 %v8174_v57, %v9703_v6  ;;  %8185 = vrcp.f32 %v5489_v18 }
 0x537   : > { %7972 = vmatprep.subr.mxu0 %v10065_v62  ;;  %7969 = vmatprep.mubr.msk.f32.mxu1 %vm8345_vm0, %v10065_v62 }
 0x538   : > { %7965 = vmatmul.mubr.msk.f32.vlgmr.msra.gmra.mxu0 %vm5351_vm5, %v5519_v22  ;;  %7977 = vmatprep.subr.mxu1 %v10065_v62 }
 0x539   : > { %v8176_v49 = vpop.eup %8175  ;;  %v5492_v3 = vpop.xlane.xlu1 %5491  ;;  %7973 = vmatpush3.msra.mxu0 %v2462_v21  ;;  %7974 = vmatprep.mubr.msk.f32.mxu0 %vm8345_vm0, %v10065_v62 }
 0x53a   : > { %v5495_v26 = vpop.xlane.xlu0 %5494  ;;  %v8178_v63 = vpop.eup %8177  ;;  %7982 = vmatprep.subr.mxu0 %v10065_v62  ;;  %v5520_v50 = vmul.f32 %v8176_v49, %v9709_v44  ;;  %8187 = vrcp.f32 %v5492_v3 }
 0x53b   : > { %v5521_v0 = vmul.f32 %v8178_v63, %v9711_v9  ;;  %8189 = vrcp.f32 %v5495_v26 }
 0x53c   : > { %7970 = vmatmul.mubr.msk.f32.vlgmr.msra.gmra.mxu1 %vm5351_vm5, %v5520_v50 }
 0x53d   : > { %v1906_v6 = vpop.permute.xlu1 %1905  ;;  %7975 = vmatmul.mubr.msk.f32.vlgmr.msra.gmra.mxu0 %vm5351_vm5, %v5521_v0  ;;  %7978 = vmatpush3.msra.mxu1 %v2463_v55 }
 0x53e   : > { %v1908_v34 = vpop.permute.xlu0 %1907  ;;  %v8180_v19 = vpop.eup %8179  ;;  %v2093_v20 = vcombine.low %v9745_v58, %v1906_v6  ;;  %v2094_v21 = vcombine.high %v9745_v58, %v1906_v6  ;;  %7983 = vmatpush3.msra.mxu0 %v2464_v11  ;;  %7979 = vmatprep.mubr.msk.f32.mxu1 %vm8345_vm0, %v10065_v62 }
 0x53f   : > { %v2109_v44 = vcombine.low %v9747_v15, %v1908_v34  ;;  %v2110_v9 = vcombine.high %v9747_v15, %v1908_v34  ;;  %v8182_v8 = vpop.eup %8181  ;;  %7984 = vmatprep.mubr.msk.f32.mxu0 %vm8345_vm0, %v10065_v62  ;;  %v5522_v55 = vmul.f32 %v8180_v19, %v9717_v31  ;;  %7987 = vmatprep.subr.mxu1 %v10065_v62 }
 0x540   : > { %v2101_v17 = vrot.slane %v2093_v20, %v8562_v41  ;;  %v2108_v45 = vrot.slane %v2094_v21, %v8562_v41  ;;  %v5523_v14 = vmul.f32 %v8182_v8, %v9719_v12  ;;  %7992 = vmatprep.subr.mxu0 %v10065_v62 }
 0x541   : > { %v2117_v5 = vrot.slane %v2109_v44, %v8562_v41  ;;  %v2124_v46 = vrot.slane %v2110_v9, %v8562_v41  ;;  %7980 = vmatmul.mubr.msk.f32.vlgmr.msra.gmra.mxu1 %vm5351_vm5, %v5522_v55 }
 0x542   : > { %7989 = vmatprep.mubr.msk.f32.mxu1 %vm8345_vm0, %v10065_v62  ;;  %7985 = vmatmul.mubr.msk.f32.vlgmr.msra.gmra.mxu0 %vm5351_vm5, %v5523_v14  ;;  %v8184_v36 = vpop.eup %8183 }
 0x543   : > { %v2157_v35 = vcombine.low %v2101_v17, %v2117_v5  ;;  %v2158_v11 = vcombine.high %v2101_v17, %v2117_v5  ;;  %v2173_v31 = vcombine.low %v2108_v45, %v2124_v46  ;;  %v2174_v59 = vcombine.high %v2108_v45, %v2124_v46  ;;  %7994 = vmatprep.mubr.msk.f32.mxu0 %vm8345_vm0, %v10065_v62  ;;  %v8186_v1 = vpop.eup %8185 }
 0x544   : > { %v5524_v47 = vmul.f32 %v8184_v36, %v9725_v40  ;;  %v5525_v2 = vmul.f32 %v8186_v1, %v9727_v56 }
 0x545   : > { %v2165_v58 = vrot.slane %v2157_v35, %v10071_v52  ;;  %v2172_v37 = vrot.slane %v2158_v11, %v10071_v52  ;;  %v2181_v15 = vrot.slane %v2173_v31, %v10071_v52  ;;  %v2188_v12 = vrot.slane %v2174_v59, %v10071_v52 }
 0x547   : > { %v7532_v24 = vcombine.low %v2165_v58, %v2172_v37  ;;  %v7534_v29 = vcombine.high %v2165_v58, %v2172_v37  ;;  %v7536_v4 = vcombine.low %v2181_v15, %v2188_v12  ;;  %v7538_v51 = vcombine.high %v2181_v15, %v2188_v12  ;;  %v8188_v30 = vpop.eup %8187 }
 0x548   : > { %v8190_v10 = vpop.eup %8189  ;;  %v5526_v57 = vmul.f32 %v8188_v30, %v9733_v25 }
 0x549   : > { %v2348_v16 = vrot.slane %v7532_v24, %v8562_v41  ;;  %v2364_v7 = vrot.slane %v7534_v29, %v8562_v41  ;;  %v2380_v28 = vrot.slane %v7536_v4, %v8562_v41  ;;  %v2396_v38 = vrot.slane %v7538_v51, %v8562_v41 }
 0x54a   : > { %v5527_v40 = vmul.f32 %v8190_v10, %v9735_v43 }
 0x54b   : > { %v2413_v27 = vcombine.low %v2348_v16, %v2364_v7  ;;  %v2445_v39 = vcombine.low %v2380_v28, %v2396_v38  ;;  %v2414_v60 = vcombine.high %v2348_v16, %v2364_v7  ;;  %v2446_v33 = vcombine.high %v2380_v28, %v2396_v38 }
 0x54d   : > { %v2421_v61 = vrot.slane %v2413_v27, %v10071_v52  ;;  %v2453_v53 = vrot.slane %v2445_v39, %v10071_v52  ;;  %v2428_v13 = vrot.slane %v2414_v60, %v10071_v52  ;;  %v2460_v23 = vrot.slane %v2446_v33, %v10071_v52 }
 0x54f   : > { %v2465_v54 = vcombine.low %v2421_v61, %v2453_v53  ;;  %v2466_v42 = vcombine.high %v2421_v61, %v2453_v53  ;;  %v2467_v32 = vcombine.low %v2428_v13, %v2460_v23  ;;  %v2468_v48 = vcombine.high %v2428_v13, %v2460_v23 }
 0x551   : > { %7988 = vmatpush3.msra.mxu1 %v2465_v54  ;;  %7993 = vmatpush3.msra.mxu0 %v2466_v42 }
 0x552   : > { %7990 = vmatmul.mubr.msk.f32.vlgmr.msra.gmra.mxu1 %vm5351_vm5, %v5524_v47  ;;  %7995 = vmatmul.mubr.msk.f32.vlgmr.msra.gmra.mxu0 %vm5351_vm5, %v5525_v2 }
 0x553   : > { %7997 = vmatprep.subr.mxu1 %v10065_v62  ;;  %8002 = vmatprep.subr.mxu0 %v10065_v62 }
 0x554   : > { %7998 = vmatpush3.msra.mxu1 %v2467_v32  ;;  %8003 = vmatpush3.msra.mxu0 %v2468_v48 }
 0x555   : > { %7999 = vmatprep.mubr.msk.f32.mxu1 %vm8345_vm0, %v10065_v62  ;;  %8004 = vmatprep.mubr.msk.f32.mxu0 %vm8345_vm0, %v10065_v62 }
 0x556   : > { %8000 = vmatmul.mubr.msk.f32.vlgmr.msra.gmra.mxu1 %vm5351_vm5, %v5526_v57  ;;  %8005 = vmatmul.mubr.msk.f32.vlgmr.msra.gmra.mxu0 %vm5351_vm5, %v5527_v40 }
 0x557   : > { %8007 = vmatprep.subr.mxu1 %v10065_v62  ;;  %8015 = vmatprep.mubr.msk.f32.mxu1 %vm8345_vm0, %v10065_v62  ;;  %vm7323_vm0 = vcmask 228352  }
 0x5e4   : > { %v5597_v56 = vpop.f32.mrf.mxu1 }
 0x5e6   : > { %v7931_v18 = vpop.f32.mrf.mxu1 }
 0x5e8   : > { %v5670_v25 = vpop.f32.mrf.mxu0 }
 0x5ea   : > { %v7936_v22 = vpop.f32.mrf.mxu0 }
 0x5ec   : > { %v5743_v43 = vpop.f32.mrf.mxu1 }
 0x5ed   : > { %v6696_v3 = vcombine.low %v5597_v56, %v5743_v43  ;;  %v6697_v26 = vcombine.high %v5597_v56, %v5743_v43 }
 0x5ee   : > { %v7941_v49 = vpop.f32.mrf.mxu1 }
 0x5ef   : > { %v6704_v19 = vrot.slane %v6696_v3, %v8562_v41  ;;  %v6711_v20 = vrot.slane %v6697_v26, %v8562_v41 }
 0x5f0   : > { %v5816_v63 = vpop.f32.mrf.mxu0 }
 0x5f1   : > { %v6712_v50 = vcombine.low %v5670_v25, %v5816_v63  ;;  %v6713_v0 = vcombine.high %v5670_v25, %v5816_v63  ;;  %v5889_v6 = vpop.f32.mrf.mxu1 }
 0x5f2   : > { %v7946_v34 = vpop.f32.mrf.mxu0 }
 0x5f3   : > { %v6720_v21 = vrot.slane %v6712_v50, %v8562_v41  ;;  %v6727_v44 = vrot.slane %v6713_v0, %v8562_v41  ;;  %v7951_v9 = vpop.f32.mrf.mxu1 }
 0x5f4   : > { %v5962_v8 = vpop.f32.mrf.mxu0 }
 0x5f5   : > { %v6760_v55 = vcombine.low %v6704_v19, %v6720_v21  ;;  %v6761_v17 = vcombine.high %v6704_v19, %v6720_v21  ;;  %v6776_v45 = vcombine.low %v6711_v20, %v6727_v44  ;;  %v6777_v5 = vcombine.high %v6711_v20, %v6727_v44  ;;  %v6035_v46 = vpop.f32.mrf.mxu1 }
 0x5f6   : > { %v7956_v14 = vpop.f32.mrf.mxu0  ;;  %v6728_v37 = vcombine.low %v5889_v6, %v6035_v46  ;;  %v6729_v15 = vcombine.high %v5889_v6, %v6035_v46 }
 0x5f7   : > { %v6768_v35 = vrot.slane %v6760_v55, %v10071_v52  ;;  %v6775_v11 = vrot.slane %v6761_v17, %v10071_v52  ;;  %v6784_v31 = vrot.slane %v6776_v45, %v10071_v52  ;;  %v6791_v59 = vrot.slane %v6777_v5, %v10071_v52  ;;  %v7961_v58 = vpop.f32.mrf.mxu1 }
 0x5f8   : > { %v6108_v12 = vpop.f32.mrf.mxu0  ;;  %v6736_v60 = vrot.slane %v6728_v37, %v8562_v41  ;;  %v6743_v33 = vrot.slane %v6729_v15, %v8562_v41 }
 0x5f9   : > { %v7619_v24 = vcombine.low %v6768_v35, %v6775_v11  ;;  %v7621_v29 = vcombine.high %v6768_v35, %v6775_v11  ;;  %v7623_v4 = vcombine.low %v6784_v31, %v6791_v59  ;;  %v7625_v51 = vcombine.high %v6784_v31, %v6791_v59 }
 0x5fa   : > { %v6744_v16 = vcombine.low %v5962_v8, %v6108_v12  ;;  %v6745_v7 = vcombine.high %v5962_v8, %v6108_v12  ;;  %v7966_v28 = vpop.f32.mrf.mxu0 }
 0x5fb   : > { %v6976_v38 = vrot.slane %v7619_v24, %v8562_v41  ;;  %v6992_v36 = vrot.slane %v7621_v29, %v8562_v41  ;;  %v7008_v27 = vrot.slane %v7623_v4, %v8562_v41  ;;  %v7024_v39 = vrot.slane %v7625_v51, %v8562_v41 }
 0x5fc   : > { %v6752_v1 = vrot.slane %v6744_v16, %v8562_v41  ;;  %v6759_v61 = vrot.slane %v6745_v7, %v8562_v41  ;;  %v6181_v53 = vpop.f32.mrf.mxu1 }
 0x5fd   : > { %v6254_v13 = vpop.f32.mrf.mxu0  ;;  %v7033_v23 = vcombine.high %v6976_v38, %v6992_v36  ;;  %v7065_v30 = vcombine.high %v7008_v27, %v7024_v39  ;;  %v7032_v54 = vcombine.low %v6976_v38, %v6992_v36  ;;  %v7064_v42 = vcombine.low %v7008_v27, %v7024_v39 }
 0x5fe   : > { %v6792_v47 = vcombine.low %v6736_v60, %v6752_v1  ;;  %v6793_v2 = vcombine.high %v6736_v60, %v6752_v1  ;;  %v6808_v10 = vcombine.low %v6743_v33, %v6759_v61  ;;  %v6809_v32 = vcombine.high %v6743_v33, %v6759_v61  ;;  %v7971_v48 = vpop.f32.mrf.mxu1 }
 0x5ff   : > { %v7976_v57 = vpop.f32.mrf.mxu0  ;;  %v7047_v40 = vrot.slane %v7033_v23, %v10071_v52  ;;  %v7079_v56 = vrot.slane %v7065_v30, %v10071_v52  ;;  %v9893_v18 = vrot.slane %v7032_v54, %v10071_v52  ;;  %v9896_v25 = vrot.slane %v7064_v42, %v10071_v52 }
 0x600   : > { %v6800_v22 = vrot.slane %v6792_v47, %v10071_v52  ;;  %v6807_v43 = vrot.slane %v6793_v2, %v10071_v52  ;;  %v6816_v49 = vrot.slane %v6808_v10, %v10071_v52  ;;  %v6823_v3 = vrot.slane %v6809_v32, %v10071_v52  ;;  %v7330_v2 = vld [vmem:[#allocation7 + $0x18] sm:$0xff] }
 0x601   : > { %v6327_v26 = vpop.f32.mrf.mxu1  ;;  %v7098_v63 = vcombine.low %v7047_v40, %v7079_v56  ;;  %v7097_v50 = vcombine.high %v9893_v18, %v9896_v25  ;;  %v7096_v0 = vcombine.low %v9893_v18, %v9896_v25  ;;  %v7099_v55 = vcombine.high %v7047_v40, %v7079_v56  ;;  %8008 = vmatpush3.msra.mxu1 %v7330_v2 }
 0x602   : > { %v7620_v6 = vcombine.low %v6800_v22, %v6807_v43  ;;  %v7622_v34 = vcombine.high %v6800_v22, %v6807_v43  ;;  %v7624_v19 = vcombine.low %v6816_v49, %v6823_v3  ;;  %v7626_v20 = vcombine.high %v6816_v49, %v6823_v3  ;;  %v6400_v9 = vpop.f32.mrf.mxu0  ;;  %8009 = vmatprep.subr.mxu1 %v10065_v62 }
 0x603   : > { %v6832_v21 = vcombine.low %v6181_v53, %v6327_v26  ;;  %v6833_v44 = vcombine.high %v6181_v53, %v6327_v26  ;;  %v7981_v8 = vpop.f32.mrf.mxu1  ;;  %7245 = vrot.lane.b32.xlu0 %v7098_v63, %s8364_s28  ;;  %7241 = vrot.lane.b32.xlu1 %v7097_v50, %s8365_s29  ;;  %v6848_v11 = vcombine.low %v6254_v13, %v6400_v9  ;;  %s284_s28 = sand.u32 1, %s8329_s22  }
 0x604   : > { %v6983_v17 = vrot.slane %v7620_v6, %v8562_v41  ;;  %v6999_v45 = vrot.slane %v7622_v34, %v8562_v41  ;;  %v7015_v5 = vrot.slane %v7624_v19, %v8562_v41  ;;  %v7031_v46 = vrot.slane %v7626_v20, %v8562_v41  ;;  %v7986_v59 = vpop.f32.mrf.mxu0  ;;  %s7519_s29 = sshll.u32 %s284_s28, 3 }
 0x605   : > { %v6840_v14 = vrot.slane %v6832_v21, %v8562_v41  ;;  %v6847_v35 = vrot.slane %v6833_v44, %v8562_v41  ;;  %v6849_v31 = vcombine.high %v6254_v13, %v6400_v9  ;;  %v6856_v24 = vrot.slane %v6848_v11, %v8562_v41 }
 0x606   : > { %v7048_v58 = vcombine.low %v6983_v17, %v6999_v45  ;;  %v7080_v37 = vcombine.low %v7015_v5, %v7031_v46  ;;  %v7049_v15 = vcombine.high %v6983_v17, %v6999_v45  ;;  %v7081_v12 = vcombine.high %v7015_v5, %v7031_v46 }
 0x607   : > { %v6863_v29 = vrot.slane %v6849_v31, %v8562_v41  ;;  %7249 = vrot.lane.b32.xlu1 %v7099_v55, %s8366_s10  ;;  %v6896_v16 = vcombine.low %v6840_v14, %v6856_v24  ;;  %v6897_v7 = vcombine.high %v6840_v14, %v6856_v24  ;;  %s7637_s10 = sshll.u32 %s8436_s25, 7  ;;  %s8379_s25 = smov [#allocation8]  }
 0x608   : > { %v7056_v4 = vrot.slane %v7048_v58, %v10071_v52  ;;  %v7088_v51 = vrot.slane %v7080_v37, %v10071_v52  ;;  %v7063_v39 = vrot.slane %v7049_v15, %v10071_v52  ;;  %v7095_v60 = vrot.slane %v7081_v12, %v10071_v52 }
 0x609   : > { %v6912_v28 = vcombine.low %v6847_v35, %v6863_v29  ;;  %v6913_v38 = vcombine.high %v6847_v35, %v6863_v29  ;;  %v6904_v33 = vrot.slane %v6896_v16, %v10071_v52  ;;  %v6911_v1 = vrot.slane %v6897_v7, %v10071_v52  ;;  %v7329_v29 = vld [vmem:[#allocation7 + $0x10] sm:$0xff] }
 0x60a   : > { %v7101_v36 = vcombine.high %v7056_v4, %v7088_v51  ;;  %v7100_v27 = vcombine.low %v7056_v4, %v7088_v51  ;;  %v7103_v42 = vcombine.high %v7063_v39, %v7095_v60  ;;  %v7102_v47 = vcombine.low %v7063_v39, %v7095_v60  ;;  %v7328_v4 = vld [vmem:[#allocation7 + $0x8] sm:$0xff]  ;;  %8010 = vmatpush3.msra.mxu1 %v7329_v29 }
 0x60b   : > { %v6920_v61 = vrot.slane %v6912_v28, %v10071_v52  ;;  %v6927_v53 = vrot.slane %v6913_v38, %v10071_v52  ;;  %v7627_v13 = vcombine.low %v6904_v33, %v6911_v1  ;;  %v7629_v23 = vcombine.high %v6904_v33, %v6911_v1  ;;  %8011 = vmatprep.subr.mxu1 %v10065_v62 }
 0x60c   : > { %7257 = vrot.lane.b32.xlu1 %v7101_v36, %s8367_s11  ;;  %7253 = vrot.lane.b32.xlu0 %v7100_v27, %s8368_s13  ;;  %s286_s11 = scalar_lea.vmem [#allocation8], %s7519_s29 }
 0x60d   : > { %v7631_v30 = vcombine.low %v6920_v61, %v6927_v53  ;;  %v7633_v54 = vcombine.high %v6920_v61, %v6927_v53  ;;  %v7112_v10 = vrot.slane %v7627_v13, %v8562_v41  ;;  %v7128_v32 = vrot.slane %v7629_v23, %v8562_v41  ;;  %8012 = vmatpush3.msra.mxu1 %v7328_v4  ;;  %v7327_v53 = vld [vmem:[#allocation7] sm:$0xff]  ;;  %s7419_s13 = sshll.u32 %s286_s11, 4  ;;  %s9963_s13 = int_to_ptr.vmem [resolvable:$true] %s7419_s13 }
 0x60e   : > { %8013 = vmatprep.subr.mxu1 %v10065_v62 }
 0x60f   : > { %v7144_v48 = vrot.slane %v7631_v30, %v8562_v41  ;;  %v7160_v57 = vrot.slane %v7633_v54, %v8562_v41  ;;  %v7168_v22 = vcombine.low %v7112_v10, %v7128_v32  ;;  %v7169_v49 = vcombine.high %v7112_v10, %v7128_v32  ;;  %8014 = vmatpush3.msra.mxu1 %v7327_v53 }
 0x610   : > { %7265 = vrot.lane.b32.xlu1 %v7103_v42, %s8369_s15  ;;  %7261 = vrot.lane.b32.xlu0 %v7102_v47, %s8370_s9 }
 0x611   : > { %v7200_v43 = vcombine.low %v7144_v48, %v7160_v57  ;;  %v7201_v3 = vcombine.high %v7144_v48, %v7160_v57  ;;  %v7176_v50 = vrot.slane %v7168_v22, %v10071_v52  ;;  %v7183_v44 = vrot.slane %v7169_v49, %v10071_v52 }
 0x612   : > { %v6473_v40 = vpop.f32.mrf.mxu1  ;;  %v6546_v56 = vpop.f32.mrf.mxu0 }
 0x613   : > { %v7208_v6 = vrot.slane %v7200_v43, %v10071_v52  ;;  %v7215_v9 = vrot.slane %v7201_v3, %v10071_v52 }
 0x614   : > { %v7991_v26 = vpop.f32.mrf.mxu1  ;;  %v7996_v63 = vpop.f32.mrf.mxu0 }
 0x615   : > { %v7233_v19 = vcombine.high %v7176_v50, %v7208_v6  ;;  %v7232_v20 = vcombine.low %v7176_v50, %v7208_v6  ;;  %v7235_v59 = vcombine.high %v7183_v44, %v7215_v9  ;;  %v7234_v58 = vcombine.low %v7183_v44, %v7215_v9 }
 0x616   : > { %v6619_v34 = vpop.f32.mrf.mxu1  ;;  %v6692_v21 = vpop.f32.mrf.mxu0 }
 0x617   : > { %v6864_v8 = vcombine.low %v6473_v40, %v6619_v34  ;;  %v6865_v55 = vcombine.high %v6473_v40, %v6619_v34  ;;  %v6880_v17 = vcombine.low %v6546_v56, %v6692_v21  ;;  %v6881_v45 = vcombine.high %v6546_v56, %v6692_v21  ;;  %7273 = vrot.lane.b32.xlu1 %v7233_v19, %s8371_s12  ;;  %s9961_s12 = scalar_lea.hbm %s10009_s6, %s7637_s10 }
 0x618   : > { %7269 = vrot.lane.b32.xlu0 %v7232_v20, %s8372_s14  ;;  %v8001_v5 = vpop.f32.mrf.mxu1  ;;  %v8006_v46 = vpop.f32.mrf.mxu0  ;;  %s7406_s14 = scalar_lea.sflag [#allocation4], %s284_s28 }
 0x619   : > { %v6872_v14 = vrot.slane %v6864_v8, %v8562_v41  ;;  %v6879_v35 = vrot.slane %v6865_v55, %v8562_v41  ;;  %v6888_v11 = vrot.slane %v6880_v17, %v8562_v41  ;;  %v6895_v31 = vrot.slane %v6881_v45, %v8562_v41 }
 0x61b   : > { %v6928_v37 = vcombine.low %v6872_v14, %v6888_v11  ;;  %v6929_v15 = vcombine.high %v6872_v14, %v6888_v11  ;;  %v6944_v12 = vcombine.low %v6879_v35, %v6895_v31  ;;  %v6945_v24 = vcombine.high %v6879_v35, %v6895_v31  ;;  %7281 = vrot.lane.b32.xlu1 %v7235_v59, %s8373_s16  ;;  %s8269_s16 = scalar_lea.vmem %s9963_s13, 128 }
 0x61c   : > { %7277 = vrot.lane.b32.xlu0 %v7234_v58, %s8374_s17  ;;  %p8270_p10 = scmp.ne.s32.totalorder %s9963_s13, %s8269_s16  ;;  %s8273_s17 = sshll.u32 %s8379_s25, 4  ;;  %s8274_s17 = int_to_ptr.vmem [resolvable:$false] %s8273_s17 }
 0x61d   : > { %v6936_v51 = vrot.slane %v6928_v37, %v10071_v52  ;;  %v6943_v16 = vrot.slane %v6929_v15, %v10071_v52  ;;  %v6952_v7 = vrot.slane %v6944_v12, %v10071_v52  ;;  %v6959_v28 = vrot.slane %v6945_v24, %v10071_v52  ;;  %p8276_p7 = scmp.lt.s32.totalorder %s9963_s13, %s8274_s17 }
 0x61e   : > { %p8271_p2 = pnand %p8270_p10, %p10080_p12 }
 0x61f   : > { %v7628_v38 = vcombine.low %v6936_v51, %v6943_v16  ;;  %v7630_v36 = vcombine.high %v6936_v51, %v6943_v16  ;;  %v7632_v27 = vcombine.low %v6952_v7, %v6959_v28  ;;  %v7634_v39 = vcombine.high %v6952_v7, %v6959_v28 }
 0x620   : > { %p8272_p4 = pneg %p8271_p2 }
 0x621   : > { %v7119_v60 = vrot.slane %v7628_v38, %v8562_v41  ;;  %v7135_v33 = vrot.slane %v7630_v36, %v8562_v41  ;;  %v7151_v1 = vrot.slane %v7632_v27, %v8562_v41  ;;  %v7167_v61 = vrot.slane %v7634_v39, %v8562_v41 }
 0x623   : > { %v7184_v13 = vcombine.low %v7119_v60, %v7135_v33  ;;  %v7216_v23 = vcombine.low %v7151_v1, %v7167_v61  ;;  %v7185_v30 = vcombine.high %v7119_v60, %v7135_v33  ;;  %v7217_v54 = vcombine.high %v7151_v1, %v7167_v61 }
 0x625   : > { %v7192_v42 = vrot.slane %v7184_v13, %v10071_v52  ;;  %v7224_v47 = vrot.slane %v7216_v23, %v10071_v52  ;;  %v7199_v10 = vrot.slane %v7185_v30, %v10071_v52  ;;  %v7231_v32 = vrot.slane %v7217_v54, %v10071_v52 }
 0x627   : > { %v7237_v2 = vcombine.high %v7192_v42, %v7224_v47  ;;  %v7236_v62 = vcombine.low %v7192_v42, %v7224_v47  ;;  %v7239_v41 = vcombine.high %v7199_v10, %v7231_v32  ;;  %v7238_v48 = vcombine.low %v7199_v10, %v7231_v32 }
 0x629   : > { %7289 = vrot.lane.b32.xlu1 %v7237_v2, %s8375_s18  ;;  %7285 = vrot.lane.b32.xlu0 %v7236_v62, %s8376_s19  ;;  %s8275_s18 = scalar_lea.vmem %s8274_s17, 256 }
 0x62a   : > { %p8277_p8 = scmp.lt.s32.totalorder %s8275_s18, %s8269_s16 }
 0x62c   : > { %p8278_p11 = por %p8277_p8, %p8276_p7 }
 0x62d   : > { %7297 = vrot.lane.b32.xlu1 %v7239_v41, %s8377_s20  ;;  %7293 = vrot.lane.b32.xlu0 %v7238_v48, %s8378_s26 }
 0x62e   : > { %p8279_p0 = pnand %p8278_p11, %p8272_p4 }
 0x675   : > { %v7242_v57 = vpop.permute.xlu1 %7241  ;;  %v7246_v40 = vpop.permute.xlu0 %7245 }
 0x676   : > { %v7300_v52 = vsel %vm2917_vm3, %v7096_v0, %v7242_v57  ;;  %vm7325_vm3 = vcmask 244736  }
 0x677   : > { %v7302_v3 = vsel %vm7301_vm6, %v7300_v52, %v7246_v40 }
 0x679   : > { %v7250_v56 = vpop.permute.xlu1 %7249 }
 0x67a   : > { %v7304_v26 = vsel %vm7303_vm7, %v7302_v3, %v7250_v56 }
 0x67e   : > { %v7254_v22 = vpop.permute.xlu0 %7253  ;;  %v7258_v43 = vpop.permute.xlu1 %7257 }
 0x67f   : > { %v7305_v50 = vsel %vm5351_vm5, %v7304_v26, %v7254_v22 }
 0x680   : > { %v7307_v6 = vsel %vm7306_vm8, %v7305_v50, %v7258_v43 }
 0x682   : > { %v7262_v49 = vpop.permute.xlu0 %7261  ;;  %v7266_v63 = vpop.permute.xlu1 %7265 }
 0x683   : > { %v7309_v19 = vsel %vm7308_vm9, %v7307_v6, %v7262_v49 }
 0x684   : > { %v7311_v21 = vsel %vm7310_vm10, %v7309_v19, %v7266_v63 }
 0x689   : > { %v7274_v20 = vpop.permute.xlu1 %7273 }
 0x68a   : > { %v7270_v34 = vpop.permute.xlu0 %7269 }
 0x68b   : > { %v7312_v18 = vsel %vm374_vm2, %v7311_v21, %v7270_v34 }
 0x68c   : > { %v7314_v44 = vsel %vm7313_vm11, %v7312_v18, %v7274_v20 }
 0x68d   : > { %v7282_v0 = vpop.permute.xlu1 %7281 }
 0x68e   : > { %v7278_v25 = vpop.permute.xlu0 %7277 }
 0x68f   : > { %v7316_v9 = vsel %vm7315_vm12, %v7314_v44, %v7278_v25 }
 0x690   : > { %v7318_v55 = vsel %vm7317_vm13, %v7316_v9, %v7282_v0 }
 0x69b   : > { %v7290_v8 = vpop.permute.xlu1 %7289  ;;  %v7286_v17 = vpop.permute.xlu0 %7285 }
 0x69c   : > { %v7320_v45 = vsel %vm7319_vm14, %v7318_v55, %v7286_v17 }
 0x69d   : > { %v7322_v46 = vsel %vm7321_vm15, %v7320_v45, %v7290_v8 }
 0x69f   : > { %v7298_v5 = vpop.permute.xlu1 %7297  ;;  %v7294_v14 = vpop.permute.xlu0 %7293 }
 0x6a0   : > { %v7324_v35 = vsel %vm7323_vm0, %v7322_v46, %v7294_v14 }
 0x6a1   : > { %v7326_v11 = vsel %vm7325_vm3, %v7324_v35, %v7298_v5 }
 0x6a2   : > { %8016 = vmatmul.mubr.msk.f32.vlgmr.msra.gmra.mxu1 %vm298_vm1, %v7326_v11 }
 0x762   : > { %v7400_v31 = vpop.f32.mrf.mxu1 }
 0x763   : > { %7404 = vst.msk [vmem:[%s286_s11] sm:$0xff] %vm298_vm1, %v7400_v31 }
 0x764   : > { %v8017_v59 = vpop.f32.mrf.mxu1 }
 0x765   : > { %8282 = shalt.err (!%p8279_p0)
}
 0x766   : > { %s8283_s19 = scalar_lea.hbm %s9961_s12, 128  ;;  %s8287_s28 = scalar_lea.hbm %s10009_s6, 256 }
 0x767   : > { %p8284_p6 = scmp.ne.s32.totalorder %s9961_s12, %s8283_s19  ;;  %p8288_p1 = scmp.lt.s32.totalorder %s9961_s12, %s10009_s6 }
 0x768   : > { %p8289_p5 = scmp.lt.s32.totalorder %s8287_s28, %s8283_s19 }
 0x769   : > { %p8285_p9 = pnand %p8284_p6, %p10080_p12 }
 0x76a   : > { %p8290_p3 = por %p8289_p5, %p8288_p1 }
 0x76b   : > { %p8286_p13 = pneg %p8285_p9 }
 0x76d   : > { %p8291_p10 = pnand %p8290_p3, %p8286_p13 }
 0x76f   : > { %8294 = shalt.err (!%p8291_p10)
}
 0x770   : > { %8030 = dma.vmem_to_hbm [thread:$0]  (%p10080_p12), %s9963_s13, 128, %s9961_s12, %s7406_s14  }
 0x771 PF: > { %p8052_p2 = scmp.ge.s32.totalorder %s8337_s24, 2  ;;  %s7431_s11 = sand.u32 1, %s8325_s21  }
 0x772   : > { %p10081_p4 = scmp.ne.s32.totalorder %s10024_s8, 0  ;;  %s7432_s15 = scalar_lea.sflag [#allocation4], %s7431_s11 }
 0x774   : > { %p8043_p7 = pnand %p8052_p2, %p10081_p4 }
 0x776   : > { %p8044_p8 = pneg %p8043_p7 }
 0x778   : > { %8320 = dma.done.wait (%p8044_p8), %s7432_s15, 128  }
 0x779   : > { %8322 = vsyncadd (%p8044_p8), %s7432_s15, 4294967168  ;;  %p18_p11 = scmp.ge.s32.totalorder %s8440_s27, 4   ;;  %s10082_s21 = smov %s8329_s22 }
 0x77a   : > { %s10083_s22 = smov %s8333_s23  ;;  %s10084_s23 = smov %s8451_s30 }
 0x77b   : > { %s10085_s24 = smov %s8440_s27  ;;  %20 = sbr.rel (!%p18_p11) target bundleno = 5 (0x5), region = 92 }
 0x780   :  { %7437 = vsyncpa [#allocation3], 1 }
 0x781   :  { %7439 = vsyncpa [#allocation3 + $0x1], 1 }
 0x782   :  { %7440 = vsyncpa [#allocation6], 1 }
 0x783   :  { %7441 = vsyncpa [#allocation4], 1 }
 0x784   :  { %7443 = vsyncpa [#allocation4 + $0x1], 1 }

</bundles_post_ra>
